<compile_context>
chip_gen: v6e
topology: v6e:2x2x1
jax: 0.10.0
libtpu: 0.0.40
codegen_flags: <defaults>
</compile_context>

<pallas_src>
import functools

import jax
import jax.numpy as jnp
from jax.experimental import pallas as pl
from jax.experimental.pallas import tpu as pltpu


def _round_up(v, m):
    return ((v + m - 1) // m) * m


# ---------------------------------------------------------------------------
# Host-side constant builders (tiny matrices / masks shared across the grid).
# ---------------------------------------------------------------------------
def _pool_matrix(h, w, r):
    """[H*W, Ho*Wo] matrix implementing AvgPool2d(kernel=stride=r), floor mode."""
    ho, wo = h // r, w // r
    idx = jnp.arange(h * w)
    hh, ww = idx // w, idx % w
    src = (hh // r) * wo + (ww // r)
    valid = (hh < ho * r) & (ww < wo * r)
    onehot = (src[:, None] == jnp.arange(ho * wo)[None, :]) & valid[:, None]
    # 1/r^2 is exactly representable in bf16 for the usual pooling_r (power of 2).
    return (onehot.astype(jnp.float32) / float(r * r)).astype(jnp.bfloat16)


def _upsample_matrix(ho, wo, h, w):
    """[Ho*Wo, H*W] nearest-neighbour matrix matching F.interpolate(size=(h,w))."""
    idx = jnp.arange(h * w)
    hh, ww = idx // w, idx % w
    src = ((hh * ho) // h) * wo + ((ww * wo) // w)
    onehot = jnp.arange(ho * wo)[:, None] == src[None, :]
    return onehot.astype(jnp.bfloat16)          # exact 0/1 values


def _col_masks(w, n_cols, dil):
    """[3, n_cols] horizontal validity masks for the 3 kw taps (dj = -d, 0, +d)."""
    col = jnp.arange(n_cols) % w
    rows = [((col + (kw - 1) * dil >= 0) & (col + (kw - 1) * dil < w))
            for kw in range(3)]
    return jnp.stack(rows, axis=0).astype(jnp.float32)


def _conv_weight_matrix(wt, cpad):
    """[Cout, Cin, 3, 3] -> [Cout, 9*cpad] bf16, tap-major / channel-minor."""
    cout, cin = wt.shape[0], wt.shape[1]
    m = jnp.transpose(wt, (0, 2, 3, 1))                       # [Cout, 3, 3, Cin]
    m = jnp.pad(m, ((0, 0), (0, 0), (0, 0), (0, cpad - cin)))
    return m.reshape(cout, 9 * cpad).astype(jnp.bfloat16)


# ---------------------------------------------------------------------------
# Fused SCConv kernel: one batch element per grid step, all intermediates in VMEM.
# ---------------------------------------------------------------------------
def _scconv_kernel(x_ref, pmat_ref, umat_ref, mfull_ref, mpool_ref,
                   w2_ref, s2_ref, b2_ref,
                   w3_ref, s3_ref, b3_ref,
                   w4_ref, s4_ref, b4_ref,
                   o_ref, scr_ref, *, w_full, w_pool, dil, pad):
    f32 = jnp.float32
    bf16 = jnp.bfloat16

    # Zero the halo scratch once per batch element.  The zero frame around the
    # interior (and the unused channel rows up to the 8-sublane pad) supplies
    # the conv zero-padding: vertically out-of-range taps read zeros from it.
    # Re-zeroing every step (16 KiB of vst at these shapes) also keeps the
    # kernel correct when the "parallel" grid axis is sharded across cores.
    scr_ref[...] = jnp.zeros_like(scr_ref)

    x = x_ref[...].astype(f32)                          # [C, H*W]  (H*W on lanes)
    masks_full = mfull_ref[...]                         # [3, H*W]
    masks_pool = mpool_ref[...]                         # [3, Ho*Wo]

    def conv3x3_bn(flat, width, masks, wm_ref, s_ref, b_ref):
        """3x3 conv (padding == dilation, stride 1) + folded BN as ONE MXU matmul.

        flat : [C, n_cols] f32, row-major flattened image (rows of `width`).
        Returns [Cout, n_cols] f32 with n_cols on the lane axis.
        """
        cr, n_cols = flat.shape
        # Write the image into the zero-framed scratch, then build the
        # [9*Cpad, n_cols] im2col slab from 9 statically shifted lane slices.
        scr_ref[:cr, pad:pad + n_cols] = flat
        xp = scr_ref[...]                               # [Cpad, pad + HW + pad]
        taps = []
        for kh in range(3):
            for kw in range(3):
                off = pad + (kh - 1) * dil * width + (kw - 1) * dil
                t = xp[:, off:off + n_cols]             # [Cpad, n_cols]
                if kw != 1:                             # horizontal edge mask
                    t = t * masks[kw:kw + 1]
                taps.append(t)
        slab = jnp.concatenate(taps, axis=0).astype(bf16)            # [9*Cpad, n]
        y = jnp.dot(wm_ref[...], slab, preferred_element_type=f32)   # [Cout, n]
        return y * s_ref[...] + b_ref[...]              # folded inference BN

    # ---- k2 branch: AvgPool(r) -> conv3x3 + BN -> nearest upsample ----------
    pooled = jnp.dot(x.astype(bf16), pmat_ref[...],
                     preferred_element_type=f32)                      # [C, HoWo]
    k2 = conv3x3_bn(pooled, w_pool, masks_pool, w2_ref, s2_ref, b2_ref)
    up = jnp.dot(k2.astype(bf16), umat_ref[...],
                 preferred_element_type=f32)                          # [C, HW]

    # ---- k3 branch and sigmoid gate: sigmoid(identity + upsample(k2)) -------
    k3 = conv3x3_bn(x, w_full, masks_full, w3_ref, s3_ref, b3_ref)    # [C, HW]
    gate = pl.reciprocal(1.0 + jnp.exp(-(x + up)), approx=True)       # sigmoid
    mid = k3 * gate                                                   # [C, HW]

    # ---- k4 (stride handled by decimation in the wrapper) -------------------
    out = conv3x3_bn(mid, w_full, masks_full, w4_ref, s4_ref, b4_ref)
    o_ref[...] = out.astype(o_ref.dtype)


def scconv_forward(params, x, *, stride, padding, dilation, pooling_r):
    n, c, h, w = x.shape
    cout = params["w2"].shape[0]
    if padding != dilation:
        # TODO(synk): padding != dilation changes the conv output size; SCNet
        # always instantiates SCConv with padding == dilation.
        raise NotImplementedError("SCConv kernel assumes padding == dilation")
    # TODO(synk): grouped conv (groups > 1) not implemented; groups == 1 here.

    ho, wo = h // pooling_r, w // pooling_r
    hw, howo = h * w, ho * wo
    cpad = _round_up(max(c, cout, 8), 8)
    pad = _round_up(dilation * (w + 1), 128)        # halo, lane-aligned interior
    padw = pad + hw + pad

    xf = x.reshape(n, c, hw)
    pmat = _pool_matrix(h, w, pooling_r)
    umat = _upsample_matrix(ho, wo, h, w)
    mfull = _col_masks(w, hw, dilation)
    mpool = _col_masks(wo, howo, dilation)
    w2m = _conv_weight_matrix(params["w2"], cpad)
    w3m = _conv_weight_matrix(params["w3"], cpad)
    w4m = _conv_weight_matrix(params["w4"], cpad)
    s2, b2 = [p.reshape(cout, 1).astype(jnp.float32) for p in params["bn2"]]
    s3, b3 = [p.reshape(cout, 1).astype(jnp.float32) for p in params["bn3"]]
    s4, b4 = [p.reshape(cout, 1).astype(jnp.float32) for p in params["bn4"]]

    kern = functools.partial(_scconv_kernel, w_full=w, w_pool=wo,
                             dil=dilation, pad=pad)

    def shared(shape):                                  # resident, replicated block
        return pl.BlockSpec(shape, lambda i: (0, 0))

    out_flat = pl.pallas_call(
        kern,
        out_shape=jax.ShapeDtypeStruct((n, cout, hw), x.dtype),
        grid=(n,),
        in_specs=[
            pl.BlockSpec((None, c, hw), lambda i: (i, 0, 0)),
            shared((hw, howo)),                         # pooling matrix (bf16)
            shared((howo, hw)),                         # nearest-upsample matrix (bf16)
            shared((3, hw)),                            # full-res edge masks
            shared((3, howo)),                          # pooled-res edge masks
            shared((cout, 9 * cpad)), shared((cout, 1)), shared((cout, 1)),
            shared((cout, 9 * cpad)), shared((cout, 1)), shared((cout, 1)),
            shared((cout, 9 * cpad)), shared((cout, 1)), shared((cout, 1)),
        ],
        out_specs=pl.BlockSpec((None, cout, hw), lambda i: (i, 0, 0)),
        scratch_shapes=[pltpu.VMEM((cpad, padw), jnp.float32)],
        compiler_params=pltpu.CompilerParams(
            dimension_semantics=("parallel",)),
    )(xf, pmat, umat, mfull, mpool,
      w2m, s2, b2, w3m, s3, b3, w4m, s4, b4)

    out = out_flat.reshape(n, cout, h, w)
    if stride > 1:
        # Valid because padding == dilation: strided conv == stride-1 conv
        # sampled every `stride` rows/cols.
        # TODO(synk): fold this decimation into the output index_map.
        out = out[:, :, ::stride, ::stride]
    return out


# ---------------------------------------------------------------------------
# Parameter init (deterministic, synthetic).  norm_layer is BatchNorm2d in
# inference mode, folded into per-channel scale/bias.
# ---------------------------------------------------------------------------
def make_bn_params(c, key, eps=1e-5):
    ka, kb, kc, kd = jax.random.split(key, 4)
    gamma = 1.0 + 0.1 * jax.random.normal(ka, (c,), jnp.float32)
    beta = 0.1 * jax.random.normal(kb, (c,), jnp.float32)
    mean = 0.1 * jax.random.normal(kc, (c,), jnp.float32)
    var = jnp.abs(1.0 + 0.1 * jax.random.normal(kd, (c,), jnp.float32))
    scale = gamma / jnp.sqrt(var + eps)
    bias = beta - mean * scale
    return scale, bias


def init_scconv_params(key, inplanes, planes):
    ks = jax.random.split(key, 6)
    std = 0.1
    return dict(
        w2=std * jax.random.normal(ks[0], (planes, inplanes, 3, 3), jnp.float32),
        w3=std * jax.random.normal(ks[1], (planes, inplanes, 3, 3), jnp.float32),
        w4=std * jax.random.normal(ks[2], (planes, inplanes, 3, 3), jnp.float32),
        bn2=make_bn_params(planes, ks[3]),
        bn3=make_bn_params(planes, ks[4]),
        bn4=make_bn_params(planes, ks[5]),
    )


# ---------------------------------------------------------------------------
# Pure-JAX f32 reference for a numerical sanity check.
# ---------------------------------------------------------------------------
def _conv_bn_ref(x, w, scale, bias, stride, padding, dilation):
    y = jax.lax.conv_general_dilated(
        x, w, window_strides=(stride, stride),
        padding=[(padding, padding), (padding, padding)],
        rhs_dilation=(dilation, dilation),
        dimension_numbers=("NCHW", "OIHW", "NCHW"))
    return y * scale[None, :, None, None] + bias[None, :, None, None]


def scconv_ref(params, x, *, stride, padding, dilation, pooling_r):
    n, c, h, w = x.shape
    r = pooling_r
    pooled = jnp.mean(x.reshape(n, c, h // r, r, w // r, r), axis=(3, 5))
    k2 = _conv_bn_ref(pooled, params["w2"], *params["bn2"], 1, padding, dilation)
    up = jnp.repeat(jnp.repeat(k2, h // k2.shape[2], axis=2), w // k2.shape[3], axis=3)
    k3 = _conv_bn_ref(x, params["w3"], *params["bn3"], 1, padding, dilation)
    out = k3 * jax.nn.sigmoid(x + up)
    return _conv_bn_ref(out, params["w4"], *params["bn4"], stride, padding, dilation)


if __name__ == "__main__":
    key = jax.random.PRNGKey(0)
    kx, kp = jax.random.split(key)

    # SCConv(inplanes=4, planes=4, stride=1, padding=1, dilation=1, groups=1,
    #        pooling_r=4, norm_layer=BatchNorm2d-inference)
    N, C, H, W = 2, 4, 16, 16
    inplanes = planes = C
    stride, padding, dilation, groups, pooling_r = 1, 1, 1, 1, 4

    x = jax.random.normal(kx, (N, C, H, W), jnp.float32)
    params = init_scconv_params(kp, inplanes, planes)

    out = scconv_forward(params, x, stride=stride, padding=padding,
                         dilation=dilation, pooling_r=pooling_r)
    out = jax.block_until_ready(out)

    ref = scconv_ref(params, x, stride=stride, padding=padding,
                     dilation=dilation, pooling_r=pooling_r)
    err = float(jnp.max(jnp.abs(out - ref)))
    assert out.shape == (N, planes, H // stride, W // stride), out.shape
    assert err < 5e-2, f"max abs error vs reference: {err}"
    print("KERNEL_OK")
</pallas_src>

<mosaic_0001>
module attributes {stable_mosaic.version = 11 : i64} {
  func.func @_scconv_kernel(%arg0: i32, %arg1: memref<1x4x256xf32, #tpu.memory_space<vmem>>, %arg2: memref<256x16xbf16, #tpu.memory_space<vmem>>, %arg3: memref<16x256xbf16, #tpu.memory_space<vmem>>, %arg4: memref<3x256xf32, #tpu.memory_space<vmem>>, %arg5: memref<3x16xf32, #tpu.memory_space<vmem>>, %arg6: memref<4x72xbf16, #tpu.memory_space<vmem>>, %arg7: memref<4x1xf32, #tpu.memory_space<vmem>>, %arg8: memref<4x1xf32, #tpu.memory_space<vmem>>, %arg9: memref<4x72xbf16, #tpu.memory_space<vmem>>, %arg10: memref<4x1xf32, #tpu.memory_space<vmem>>, %arg11: memref<4x1xf32, #tpu.memory_space<vmem>>, %arg12: memref<4x72xbf16, #tpu.memory_space<vmem>>, %arg13: memref<4x1xf32, #tpu.memory_space<vmem>>, %arg14: memref<4x1xf32, #tpu.memory_space<vmem>>, %arg15: memref<1x4x256xf32, #tpu.memory_space<vmem>>, %arg16: memref<8x512xf32, #tpu.memory_space<vmem>>) attributes {dimension_semantics = [#tpu.dimension_semantics<parallel>], iteration_bounds = array<i64: 2>, scalar_prefetch = 0 : i64, scratch_operands = 1 : i64, tpu.core_type = #tpu.core_type<tc>, window_params = [{transform_indices = @transform_0, window_bounds = array<i64: 1, 4, 256>}, {pipeline_mode = #tpu.pipeline_mode<synchronous>, transform_indices = @transform_1, window_bounds = array<i64: 256, 16>}, {pipeline_mode = #tpu.pipeline_mode<synchronous>, transform_indices = @transform_2, window_bounds = array<i64: 16, 256>}, {pipeline_mode = #tpu.pipeline_mode<synchronous>, transform_indices = @transform_3, window_bounds = array<i64: 3, 256>}, {pipeline_mode = #tpu.pipeline_mode<synchronous>, transform_indices = @transform_4, window_bounds = array<i64: 3, 16>}, {pipeline_mode = #tpu.pipeline_mode<synchronous>, transform_indices = @transform_5, window_bounds = array<i64: 4, 72>}, {pipeline_mode = #tpu.pipeline_mode<synchronous>, transform_indices = @transform_6, window_bounds = array<i64: 4, 1>}, {pipeline_mode = #tpu.pipeline_mode<synchronous>, transform_indices = @transform_7, window_bounds = array<i64: 4, 1>}, {pipeline_mode = #tpu.pipeline_mode<synchronous>, transform_indices = @transform_8, window_bounds = array<i64: 4, 72>}, {pipeline_mode = #tpu.pipeline_mode<synchronous>, transform_indices = @transform_9, window_bounds = array<i64: 4, 1>}, {pipeline_mode = #tpu.pipeline_mode<synchronous>, transform_indices = @transform_10, window_bounds = array<i64: 4, 1>}, {pipeline_mode = #tpu.pipeline_mode<synchronous>, transform_indices = @transform_11, window_bounds = array<i64: 4, 72>}, {pipeline_mode = #tpu.pipeline_mode<synchronous>, transform_indices = @transform_12, window_bounds = array<i64: 4, 1>}, {pipeline_mode = #tpu.pipeline_mode<synchronous>, transform_indices = @transform_13, window_bounds = array<i64: 4, 1>}, {transform_indices = @transform_14, window_bounds = array<i64: 1, 4, 256>}]} {
    %cst = arith.constant 0.000000e+00 : f32
    %0 = vector.broadcast %cst : f32 to vector<8x512xf32>
    %c0 = arith.constant 0 : index
    %c0_0 = arith.constant 0 : index
    %1 = vector.load %arg16[%c0, %c0_0] : memref<8x512xf32, #tpu.memory_space<vmem>>, vector<8x512xf32>
    tpu.vector_store %arg16[%c0, %c0_0], %0 {strides = array<i32>} : memref<8x512xf32, #tpu.memory_space<vmem>>, vector<8x512xf32>,
    %c0_1 = arith.constant 0 : index
    %c0_2 = arith.constant 0 : index
    %c0_3 = arith.constant 0 : index
    %2 = vector.load %arg1[%c0_1, %c0_2, %c0_3] : memref<1x4x256xf32, #tpu.memory_space<vmem>>, vector<1x4x256xf32>
    %3 = vector.shape_cast %2 : vector<1x4x256xf32> to vector<4x256xf32>
    %c0_4 = arith.constant 0 : index
    %c0_5 = arith.constant 0 : index
    %4 = vector.load %arg4[%c0_4, %c0_5] : memref<3x256xf32, #tpu.memory_space<vmem>>, vector<3x256xf32>
    %c0_6 = arith.constant 0 : index
    %c0_7 = arith.constant 0 : index
    %5 = vector.load %arg5[%c0_6, %c0_7] : memref<3x16xf32, #tpu.memory_space<vmem>>, vector<3x16xf32>
    %6 = arith.truncf %3 : vector<4x256xf32> to vector<4x256xbf16>
    %c0_8 = arith.constant 0 : index
    %c0_9 = arith.constant 0 : index
    %7 = vector.load %arg2[%c0_8, %c0_9] : memref<256x16xbf16, #tpu.memory_space<vmem>>, vector<256x16xbf16>
    %cst_10 = arith.constant dense<0.000000e+00> : vector<4x16xf32>
    %8 = tpu.matmul %6, %7, %cst_10 {dimension_numbers = #tpu.dot_dimension_numbers<[1], [0], [0], [1], [0, 0, 1, 1], [], []>} : vector<4x256xbf16>, vector<256x16xbf16>, vector<4x16xf32> -> vector<4x16xf32>
    %c0_11 = arith.constant 0 : index
    %c128 = arith.constant 128 : index
    %9 = vector.load %arg16[%c0_11, %c128] : memref<8x512xf32, #tpu.memory_space<vmem>>, vector<4x16xf32>
    tpu.vector_store %arg16[%c0_11, %c128], %8 {strides = array<i32>} : memref<8x512xf32, #tpu.memory_space<vmem>>, vector<4x16xf32>,
    %c0_12 = arith.constant 0 : index
    %c0_13 = arith.constant 0 : index
    %10 = vector.load %arg16[%c0_12, %c0_13] : memref<8x512xf32, #tpu.memory_space<vmem>>, vector<8x512xf32>
    %11 = vector.extract_strided_slice %10 {offsets = [0, 123], sizes = [8, 16], strides = [1, 1]} : vector<8x512xf32> to vector<8x16xf32>
    %12 = vector.extract_strided_slice %5 {offsets = [0, 0], sizes = [1, 16], strides = [1, 1]} : vector<3x16xf32> to vector<1x16xf32>
    %13 = vector.broadcast %12 : vector<1x16xf32> to vector<8x16xf32>
    %14 = arith.mulf %11, %13 : vector<8x16xf32>
    %15 = vector.extract_strided_slice %10 {offsets = [0, 124], sizes = [8, 16], strides = [1, 1]} : vector<8x512xf32> to vector<8x16xf32>
    %16 = vector.extract_strided_slice %10 {offsets = [0, 125], sizes = [8, 16], strides = [1, 1]} : vector<8x512xf32> to vector<8x16xf32>
    %17 = vector.extract_strided_slice %5 {offsets = [2, 0], sizes = [1, 16], strides = [1, 1]} : vector<3x16xf32> to vector<1x16xf32>
    %18 = vector.broadcast %17 : vector<1x16xf32> to vector<8x16xf32>
    %19 = arith.mulf %16, %18 : vector<8x16xf32>
    %20 = vector.extract_strided_slice %10 {offsets = [0, 127], sizes = [8, 16], strides = [1, 1]} : vector<8x512xf32> to vector<8x16xf32>
    %21 = vector.extract_strided_slice %5 {offsets = [0, 0], sizes = [1, 16], strides = [1, 1]} : vector<3x16xf32> to vector<1x16xf32>
    %22 = vector.broadcast %21 : vector<1x16xf32> to vector<8x16xf32>
    %23 = arith.mulf %20, %22 : vector<8x16xf32>
    %24 = vector.extract_strided_slice %10 {offsets = [0, 128], sizes = [8, 16], strides = [1, 1]} : vector<8x512xf32> to vector<8x16xf32>
    %25 = vector.extract_strided_slice %10 {offsets = [0, 129], sizes = [8, 16], strides = [1, 1]} : vector<8x512xf32> to vector<8x16xf32>
    %26 = vector.extract_strided_slice %5 {offsets = [2, 0], sizes = [1, 16], strides = [1, 1]} : vector<3x16xf32> to vector<1x16xf32>
    %27 = vector.broadcast %26 : vector<1x16xf32> to vector<8x16xf32>
    %28 = arith.mulf %25, %27 : vector<8x16xf32>
    %29 = vector.extract_strided_slice %10 {offsets = [0, 131], sizes = [8, 16], strides = [1, 1]} : vector<8x512xf32> to vector<8x16xf32>
    %30 = vector.extract_strided_slice %5 {offsets = [0, 0], sizes = [1, 16], strides = [1, 1]} : vector<3x16xf32> to vector<1x16xf32>
    %31 = vector.broadcast %30 : vector<1x16xf32> to vector<8x16xf32>
    %32 = arith.mulf %29, %31 : vector<8x16xf32>
    %33 = vector.extract_strided_slice %10 {offsets = [0, 132], sizes = [8, 16], strides = [1, 1]} : vector<8x512xf32> to vector<8x16xf32>
    %34 = vector.extract_strided_slice %10 {offsets = [0, 133], sizes = [8, 16], strides = [1, 1]} : vector<8x512xf32> to vector<8x16xf32>
    %35 = vector.extract_strided_slice %5 {offsets = [2, 0], sizes = [1, 16], strides = [1, 1]} : vector<3x16xf32> to vector<1x16xf32>
    %36 = vector.broadcast %35 : vector<1x16xf32> to vector<8x16xf32>
    %37 = arith.mulf %34, %36 : vector<8x16xf32>
    %38 = tpu.concatenate %14, %15, %19, %23, %24, %28, %32, %33, %37 in 0 : vector<8x16xf32>, vector<8x16xf32>, vector<8x16xf32>, vector<8x16xf32>, vector<8x16xf32>, vector<8x16xf32>, vector<8x16xf32>, vector<8x16xf32>, vector<8x16xf32> -> vector<72x16xf32>
    %39 = arith.truncf %38 : vector<72x16xf32> to vector<72x16xbf16>
    %c0_14 = arith.constant 0 : index
    %c0_15 = arith.constant 0 : index
    %40 = vector.load %arg6[%c0_14, %c0_15] : memref<4x72xbf16, #tpu.memory_space<vmem>>, vector<4x72xbf16>
    %cst_16 = arith.constant dense<0.000000e+00> : vector<4x16xf32>
    %41 = tpu.matmul %40, %39, %cst_16 {dimension_numbers = #tpu.dot_dimension_numbers<[1], [0], [0], [1], [0, 0, 1, 1], [], []>} : vector<4x72xbf16>, vector<72x16xbf16>, vector<4x16xf32> -> vector<4x16xf32>
    %c0_17 = arith.constant 0 : index
    %c0_18 = arith.constant 0 : index
    %42 = vector.load %arg7[%c0_17, %c0_18] : memref<4x1xf32, #tpu.memory_space<vmem>>, vector<4x1xf32>
    %43 = vector.broadcast %42 : vector<4x1xf32> to vector<4x16xf32>
    %44 = arith.mulf %41, %43 : vector<4x16xf32>
    %c0_19 = arith.constant 0 : index
    %c0_20 = arith.constant 0 : index
    %45 = vector.load %arg8[%c0_19, %c0_20] : memref<4x1xf32, #tpu.memory_space<vmem>>, vector<4x1xf32>
    %46 = vector.broadcast %45 : vector<4x1xf32> to vector<4x16xf32>
    %47 = arith.addf %44, %46 : vector<4x16xf32>
    %48 = arith.truncf %47 : vector<4x16xf32> to vector<4x16xbf16>
    %c0_21 = arith.constant 0 : index
    %c0_22 = arith.constant 0 : index
    %49 = vector.load %arg3[%c0_21, %c0_22] : memref<16x256xbf16, #tpu.memory_space<vmem>>, vector<16x256xbf16>
    %cst_23 = arith.constant dense<0.000000e+00> : vector<4x256xf32>
    %50 = tpu.matmul %48, %49, %cst_23 {dimension_numbers = #tpu.dot_dimension_numbers<[1], [0], [0], [1], [0, 0, 1, 1], [], []>} : vector<4x16xbf16>, vector<16x256xbf16>, vector<4x256xf32> -> vector<4x256xf32>
    %c0_24 = arith.constant 0 : index
    %c128_25 = arith.constant 128 : index
    %51 = vector.load %arg16[%c0_24, %c128_25] : memref<8x512xf32, #tpu.memory_space<vmem>>, vector<4x256xf32>
    tpu.vector_store %arg16[%c0_24, %c128_25], %3 {strides = array<i32>} : memref<8x512xf32, #tpu.memory_space<vmem>>, vector<4x256xf32>,
    %c0_26 = arith.constant 0 : index
    %c0_27 = arith.constant 0 : index
    %52 = vector.load %arg16[%c0_26, %c0_27] : memref<8x512xf32, #tpu.memory_space<vmem>>, vector<8x512xf32>
    %53 = vector.extract_strided_slice %52 {offsets = [0, 111], sizes = [8, 256], strides = [1, 1]} : vector<8x512xf32> to vector<8x256xf32>
    %54 = vector.extract_strided_slice %4 {offsets = [0, 0], sizes = [1, 256], strides = [1, 1]} : vector<3x256xf32> to vector<1x256xf32>
    %55 = vector.broadcast %54 : vector<1x256xf32> to vector<8x256xf32>
    %56 = arith.mulf %53, %55 : vector<8x256xf32>
    %57 = vector.extract_strided_slice %52 {offsets = [0, 112], sizes = [8, 256], strides = [1, 1]} : vector<8x512xf32> to vector<8x256xf32>
    %58 = vector.extract_strided_slice %52 {offsets = [0, 113], sizes = [8, 256], strides = [1, 1]} : vector<8x512xf32> to vector<8x256xf32>
    %59 = vector.extract_strided_slice %4 {offsets = [2, 0], sizes = [1, 256], strides = [1, 1]} : vector<3x256xf32> to vector<1x256xf32>
    %60 = vector.broadcast %59 : vector<1x256xf32> to vector<8x256xf32>
    %61 = arith.mulf %58, %60 : vector<8x256xf32>
    %62 = vector.extract_strided_slice %52 {offsets = [0, 127], sizes = [8, 256], strides = [1, 1]} : vector<8x512xf32> to vector<8x256xf32>
    %63 = vector.extract_strided_slice %4 {offsets = [0, 0], sizes = [1, 256], strides = [1, 1]} : vector<3x256xf32> to vector<1x256xf32>
    %64 = vector.broadcast %63 : vector<1x256xf32> to vector<8x256xf32>
    %65 = arith.mulf %62, %64 : vector<8x256xf32>
    %66 = vector.extract_strided_slice %52 {offsets = [0, 128], sizes = [8, 256], strides = [1, 1]} : vector<8x512xf32> to vector<8x256xf32>
    %67 = vector.extract_strided_slice %52 {offsets = [0, 129], sizes = [8, 256], strides = [1, 1]} : vector<8x512xf32> to vector<8x256xf32>
    %68 = vector.extract_strided_slice %4 {offsets = [2, 0], sizes = [1, 256], strides = [1, 1]} : vector<3x256xf32> to vector<1x256xf32>
    %69 = vector.broadcast %68 : vector<1x256xf32> to vector<8x256xf32>
    %70 = arith.mulf %67, %69 : vector<8x256xf32>
    %71 = vector.extract_strided_slice %52 {offsets = [0, 143], sizes = [8, 256], strides = [1, 1]} : vector<8x512xf32> to vector<8x256xf32>
    %72 = vector.extract_strided_slice %4 {offsets = [0, 0], sizes = [1, 256], strides = [1, 1]} : vector<3x256xf32> to vector<1x256xf32>
    %73 = vector.broadcast %72 : vector<1x256xf32> to vector<8x256xf32>
    %74 = arith.mulf %71, %73 : vector<8x256xf32>
    %75 = vector.extract_strided_slice %52 {offsets = [0, 144], sizes = [8, 256], strides = [1, 1]} : vector<8x512xf32> to vector<8x256xf32>
    %76 = vector.extract_strided_slice %52 {offsets = [0, 145], sizes = [8, 256], strides = [1, 1]} : vector<8x512xf32> to vector<8x256xf32>
    %77 = vector.extract_strided_slice %4 {offsets = [2, 0], sizes = [1, 256], strides = [1, 1]} : vector<3x256xf32> to vector<1x256xf32>
    %78 = vector.broadcast %77 : vector<1x256xf32> to vector<8x256xf32>
    %79 = arith.mulf %76, %78 : vector<8x256xf32>
    %80 = tpu.concatenate %56, %57, %61, %65, %66, %70, %74, %75, %79 in 0 : vector<8x256xf32>, vector<8x256xf32>, vector<8x256xf32>, vector<8x256xf32>, vector<8x256xf32>, vector<8x256xf32>, vector<8x256xf32>, vector<8x256xf32>, vector<8x256xf32> -> vector<72x256xf32>
    %81 = arith.truncf %80 : vector<72x256xf32> to vector<72x256xbf16>
    %c0_28 = arith.constant 0 : index
    %c0_29 = arith.constant 0 : index
    %82 = vector.load %arg9[%c0_28, %c0_29] : memref<4x72xbf16, #tpu.memory_space<vmem>>, vector<4x72xbf16>
    %cst_30 = arith.constant dense<0.000000e+00> : vector<4x256xf32>
    %83 = tpu.matmul %82, %81, %cst_30 {dimension_numbers = #tpu.dot_dimension_numbers<[1], [0], [0], [1], [0, 0, 1, 1], [], []>} : vector<4x72xbf16>, vector<72x256xbf16>, vector<4x256xf32> -> vector<4x256xf32>
    %c0_31 = arith.constant 0 : index
    %c0_32 = arith.constant 0 : index
    %84 = vector.load %arg10[%c0_31, %c0_32] : memref<4x1xf32, #tpu.memory_space<vmem>>, vector<4x1xf32>
    %85 = vector.broadcast %84 : vector<4x1xf32> to vector<4x256xf32>
    %86 = arith.mulf %83, %85 : vector<4x256xf32>
    %c0_33 = arith.constant 0 : index
    %c0_34 = arith.constant 0 : index
    %87 = vector.load %arg11[%c0_33, %c0_34] : memref<4x1xf32, #tpu.memory_space<vmem>>, vector<4x1xf32>
    %88 = vector.broadcast %87 : vector<4x1xf32> to vector<4x256xf32>
    %89 = arith.addf %86, %88 : vector<4x256xf32>
    %90 = arith.addf %3, %50 : vector<4x256xf32>
    %cst_35 = arith.constant 0.000000e+00 : f32
    %91 = vector.broadcast %cst_35 : f32 to vector<4x256xf32>
    %92 = arith.subf %91, %90 : vector<4x256xf32>
    %93 = math.exp %92 : vector<4x256xf32>
    %cst_36 = arith.constant 1.000000e+00 : f32
    %94 = vector.broadcast %cst_36 : f32 to vector<4x256xf32>
    %95 = arith.addf %94, %93 : vector<4x256xf32>
    %96 = tpu.reciprocal %95 {approx = true} : vector<4x256xf32> -> vector<4x256xf32>
    %97 = arith.mulf %89, %96 : vector<4x256xf32>
    %c0_37 = arith.constant 0 : index
    %c128_38 = arith.constant 128 : index
    %98 = vector.load %arg16[%c0_37, %c128_38] : memref<8x512xf32, #tpu.memory_space<vmem>>, vector<4x256xf32>
    tpu.vector_store %arg16[%c0_37, %c128_38], %97 {strides = array<i32>} : memref<8x512xf32, #tpu.memory_space<vmem>>, vector<4x256xf32>,
    %c0_39 = arith.constant 0 : index
    %c0_40 = arith.constant 0 : index
    %99 = vector.load %arg16[%c0_39, %c0_40] : memref<8x512xf32, #tpu.memory_space<vmem>>, vector<8x512xf32>
    %100 = vector.extract_strided_slice %99 {offsets = [0, 111], sizes = [8, 256], strides = [1, 1]} : vector<8x512xf32> to vector<8x256xf32>
    %101 = vector.extract_strided_slice %4 {offsets = [0, 0], sizes = [1, 256], strides = [1, 1]} : vector<3x256xf32> to vector<1x256xf32>
    %102 = vector.broadcast %101 : vector<1x256xf32> to vector<8x256xf32>
    %103 = arith.mulf %100, %102 : vector<8x256xf32>
    %104 = vector.extract_strided_slice %99 {offsets = [0, 112], sizes = [8, 256], strides = [1, 1]} : vector<8x512xf32> to vector<8x256xf32>
    %105 = vector.extract_strided_slice %99 {offsets = [0, 113], sizes = [8, 256], strides = [1, 1]} : vector<8x512xf32> to vector<8x256xf32>
    %106 = vector.extract_strided_slice %4 {offsets = [2, 0], sizes = [1, 256], strides = [1, 1]} : vector<3x256xf32> to vector<1x256xf32>
    %107 = vector.broadcast %106 : vector<1x256xf32> to vector<8x256xf32>
    %108 = arith.mulf %105, %107 : vector<8x256xf32>
    %109 = vector.extract_strided_slice %99 {offsets = [0, 127], sizes = [8, 256], strides = [1, 1]} : vector<8x512xf32> to vector<8x256xf32>
    %110 = vector.extract_strided_slice %4 {offsets = [0, 0], sizes = [1, 256], strides = [1, 1]} : vector<3x256xf32> to vector<1x256xf32>
    %111 = vector.broadcast %110 : vector<1x256xf32> to vector<8x256xf32>
    %112 = arith.mulf %109, %111 : vector<8x256xf32>
    %113 = vector.extract_strided_slice %99 {offsets = [0, 128], sizes = [8, 256], strides = [1, 1]} : vector<8x512xf32> to vector<8x256xf32>
    %114 = vector.extract_strided_slice %99 {offsets = [0, 129], sizes = [8, 256], strides = [1, 1]} : vector<8x512xf32> to vector<8x256xf32>
    %115 = vector.extract_strided_slice %4 {offsets = [2, 0], sizes = [1, 256], strides = [1, 1]} : vector<3x256xf32> to vector<1x256xf32>
    %116 = vector.broadcast %115 : vector<1x256xf32> to vector<8x256xf32>
    %117 = arith.mulf %114, %116 : vector<8x256xf32>
    %118 = vector.extract_strided_slice %99 {offsets = [0, 143], sizes = [8, 256], strides = [1, 1]} : vector<8x512xf32> to vector<8x256xf32>
    %119 = vector.extract_strided_slice %4 {offsets = [0, 0], sizes = [1, 256], strides = [1, 1]} : vector<3x256xf32> to vector<1x256xf32>
    %120 = vector.broadcast %119 : vector<1x256xf32> to vector<8x256xf32>
    %121 = arith.mulf %118, %120 : vector<8x256xf32>
    %122 = vector.extract_strided_slice %99 {offsets = [0, 144], sizes = [8, 256], strides = [1, 1]} : vector<8x512xf32> to vector<8x256xf32>
    %123 = vector.extract_strided_slice %99 {offsets = [0, 145], sizes = [8, 256], strides = [1, 1]} : vector<8x512xf32> to vector<8x256xf32>
    %124 = vector.extract_strided_slice %4 {offsets = [2, 0], sizes = [1, 256], strides = [1, 1]} : vector<3x256xf32> to vector<1x256xf32>
    %125 = vector.broadcast %124 : vector<1x256xf32> to vector<8x256xf32>
    %126 = arith.mulf %123, %125 : vector<8x256xf32>
    %127 = tpu.concatenate %103, %104, %108, %112, %113, %117, %121, %122, %126 in 0 : vector<8x256xf32>, vector<8x256xf32>, vector<8x256xf32>, vector<8x256xf32>, vector<8x256xf32>, vector<8x256xf32>, vector<8x256xf32>, vector<8x256xf32>, vector<8x256xf32> -> vector<72x256xf32>
    %128 = arith.truncf %127 : vector<72x256xf32> to vector<72x256xbf16>
    %c0_41 = arith.constant 0 : index
    %c0_42 = arith.constant 0 : index
    %129 = vector.load %arg12[%c0_41, %c0_42] : memref<4x72xbf16, #tpu.memory_space<vmem>>, vector<4x72xbf16>
    %cst_43 = arith.constant dense<0.000000e+00> : vector<4x256xf32>
    %130 = tpu.matmul %129, %128, %cst_43 {dimension_numbers = #tpu.dot_dimension_numbers<[1], [0], [0], [1], [0, 0, 1, 1], [], []>} : vector<4x72xbf16>, vector<72x256xbf16>, vector<4x256xf32> -> vector<4x256xf32>
    %c0_44 = arith.constant 0 : index
    %c0_45 = arith.constant 0 : index
    %131 = vector.load %arg13[%c0_44, %c0_45] : memref<4x1xf32, #tpu.memory_space<vmem>>, vector<4x1xf32>
    %132 = vector.broadcast %131 : vector<4x1xf32> to vector<4x256xf32>
    %133 = arith.mulf %130, %132 : vector<4x256xf32>
    %c0_46 = arith.constant 0 : index
    %c0_47 = arith.constant 0 : index
    %134 = vector.load %arg14[%c0_46, %c0_47] : memref<4x1xf32, #tpu.memory_space<vmem>>, vector<4x1xf32>
    %135 = vector.broadcast %134 : vector<4x1xf32> to vector<4x256xf32>
    %136 = arith.addf %133, %135 : vector<4x256xf32>
    %c0_48 = arith.constant 0 : index
    %c0_49 = arith.constant 0 : index
    %c0_50 = arith.constant 0 : index
    %137 = vector.load %arg15[%c0_48, %c0_49, %c0_50] : memref<1x4x256xf32, #tpu.memory_space<vmem>>, vector<1x4x256xf32>
    %138 = vector.shape_cast %137 : vector<1x4x256xf32> to vector<4x256xf32>
    %139 = vector.shape_cast %136 : vector<4x256xf32> to vector<1x4x256xf32>
    tpu.vector_store %arg15[%c0_48, %c0_49, %c0_50], %139 {strides = array<i32>} : memref<1x4x256xf32, #tpu.memory_space<vmem>>, vector<1x4x256xf32>,
    return
  }
  func.func @transform_0(%arg0: i32) -> (i32, i32, i32) {
    %c0_i32 = arith.constant 0 : i32
    %c0_i32_0 = arith.constant 0 : i32
    %c0_i32_1 = arith.constant 0 : i32
    return %arg0, %c0_i32, %c0_i32_0 : i32, i32, i32
  }
  func.func @transform_1(%arg0: i32) -> (i32, i32) {
    %c0_i32 = arith.constant 0 : i32
    %c0_i32_0 = arith.constant 0 : i32
    %c0_i32_1 = arith.constant 0 : i32
    return %c0_i32, %c0_i32_0 : i32, i32
  }
  func.func @transform_2(%arg0: i32) -> (i32, i32) {
    %c0_i32 = arith.constant 0 : i32
    %c0_i32_0 = arith.constant 0 : i32
    %c0_i32_1 = arith.constant 0 : i32
    return %c0_i32, %c0_i32_0 : i32, i32
  }
  func.func @transform_3(%arg0: i32) -> (i32, i32) {
    %c0_i32 = arith.constant 0 : i32
    %c0_i32_0 = arith.constant 0 : i32
    %c0_i32_1 = arith.constant 0 : i32
    return %c0_i32, %c0_i32_0 : i32, i32
  }
  func.func @transform_4(%arg0: i32) -> (i32, i32) {
    %c0_i32 = arith.constant 0 : i32
    %c0_i32_0 = arith.constant 0 : i32
    %c0_i32_1 = arith.constant 0 : i32
    return %c0_i32, %c0_i32_0 : i32, i32
  }
  func.func @transform_5(%arg0: i32) -> (i32, i32) {
    %c0_i32 = arith.constant 0 : i32
    %c0_i32_0 = arith.constant 0 : i32
    %c0_i32_1 = arith.constant 0 : i32
    return %c0_i32, %c0_i32_0 : i32, i32
  }
  func.func @transform_6(%arg0: i32) -> (i32, i32) {
    %c0_i32 = arith.constant 0 : i32
    %c0_i32_0 = arith.constant 0 : i32
    %c0_i32_1 = arith.constant 0 : i32
    return %c0_i32, %c0_i32_0 : i32, i32
  }
  func.func @transform_7(%arg0: i32) -> (i32, i32) {
    %c0_i32 = arith.constant 0 : i32
    %c0_i32_0 = arith.constant 0 : i32
    %c0_i32_1 = arith.constant 0 : i32
    return %c0_i32, %c0_i32_0 : i32, i32
  }
  func.func @transform_8(%arg0: i32) -> (i32, i32) {
    %c0_i32 = arith.constant 0 : i32
    %c0_i32_0 = arith.constant 0 : i32
    %c0_i32_1 = arith.constant 0 : i32
    return %c0_i32, %c0_i32_0 : i32, i32
  }
  func.func @transform_9(%arg0: i32) -> (i32, i32) {
    %c0_i32 = arith.constant 0 : i32
    %c0_i32_0 = arith.constant 0 : i32
    %c0_i32_1 = arith.constant 0 : i32
    return %c0_i32, %c0_i32_0 : i32, i32
  }
  func.func @transform_10(%arg0: i32) -> (i32, i32) {
    %c0_i32 = arith.constant 0 : i32
    %c0_i32_0 = arith.constant 0 : i32
    %c0_i32_1 = arith.constant 0 : i32
    return %c0_i32, %c0_i32_0 : i32, i32
  }
  func.func @transform_11(%arg0: i32) -> (i32, i32) {
    %c0_i32 = arith.constant 0 : i32
    %c0_i32_0 = arith.constant 0 : i32
    %c0_i32_1 = arith.constant 0 : i32
    return %c0_i32, %c0_i32_0 : i32, i32
  }
  func.func @transform_12(%arg0: i32) -> (i32, i32) {
    %c0_i32 = arith.constant 0 : i32
    %c0_i32_0 = arith.constant 0 : i32
    %c0_i32_1 = arith.constant 0 : i32
    return %c0_i32, %c0_i32_0 : i32, i32
  }
  func.func @transform_13(%arg0: i32) -> (i32, i32) {
    %c0_i32 = arith.constant 0 : i32
    %c0_i32_0 = arith.constant 0 : i32
    %c0_i32_1 = arith.constant 0 : i32
    return %c0_i32, %c0_i32_0 : i32, i32
  }
  func.func @transform_14(%arg0: i32) -> (i32, i32, i32) {
    %c0_i32 = arith.constant 0 : i32
    %c0_i32_0 = arith.constant 0 : i32
    %c0_i32_1 = arith.constant 0 : i32
    return %arg0, %c0_i32, %c0_i32_0 : i32, i32, i32
  }
}

</mosaic_0001>

<bundles_post_ra>
// kernel: tpu_custom_call.1
= control target key start
LH: loop header
LB: loop body
LE: loop exit
PB: predicated region body
PF: predicated region fallthrough
CT: control target
= control target key end

     0   :  { %s2546_s0 = inlined_call_operand.vmem [shape: f32[2,4,256], index: 0, kind: input, shape index: {}]   ;;  %s2547_s1 = inlined_call_operand.vmem [shape: bf16[256,16], index: 1, kind: input, shape index: {}]   ;;  %s2548_s2 = inlined_call_operand.vmem [shape: bf16[16,256], index: 2, kind: input, shape index: {}]   ;;  %s2549_s3 = inlined_call_operand.vmem [shape: f32[3,256], index: 3, kind: input, shape index: {}]   ;;  %s2550_s4 = inlined_call_operand.vmem [shape: f32[3,16], index: 4, kind: input, shape index: {}]   ;;  %s2551_s5 = inlined_call_operand.vmem [shape: bf16[4,72], index: 5, kind: input, shape index: {}]   ;;  %s2552_s6 = inlined_call_operand.vmem [shape: f32[4,1], index: 6, kind: input, shape index: {}]   ;;  %s2553_s7 = inlined_call_operand.vmem [shape: f32[4,1], index: 7, kind: input, shape index: {}]   ;;  %s2554_s8 = inlined_call_operand.vmem [shape: bf16[4,72], index: 8, kind: input, shape index: {}]   ;;  %s2555_s9 = inlined_call_operand.vmem [shape: f32[4,1], index: 9, kind: input, shape index: {}]   ;;  %s2556_s10 = inlined_call_operand.vmem [shape: f32[4,1], index: 10, kind: input, shape index: {}]   ;;  %s2557_s11 = inlined_call_operand.vmem [shape: bf16[4,72], index: 11, kind: input, shape index: {}]   ;;  %s2558_s12 = inlined_call_operand.vmem [shape: f32[4,1], index: 12, kind: input, shape index: {}]   ;;  %s2559_s13 = inlined_call_operand.vmem [shape: f32[4,1], index: 13, kind: input, shape index: {}]   ;;  %s2560_s14 = inlined_call_operand.hbm [shape: f32[2,4,256], index: 14, kind: output, shape index: {}]  }
   0x1   :  { %2577 = sst [smem:[#allocation10_spill]] %s2546_s0 }
   0x2   :  { %19 = vsyncpa [#allocation4], 0 }
   0x3   :  { %21 = vsyncpa [#allocation4 + $0x1], 0  ;;  %s2059_s29 = smov 0   ;;  %s2061_s30 = smov 0  }
   0x4   :  { %s2063_s15 = smov 0   ;;  %s2065_s16 = smov 0  }
   0x5 LB: > { %2578 = sst [smem:[#allocation6_spill]] %s1953_s15  ;;  %s2080_s17 = sadd.s32 4294967295, %s1957_s16   ;;  %s1957_s16 = sphi %s2065_s16, %s2592_s16   ;;  %s1953_s15 = sphi %s2063_s15, %s2594_s15   ;;  %s1949_s30 = sphi %s2061_s30, %s2596_s30   ;;  %s1945_s29 = sphi %s2059_s29, %s2595_s29  }
   0x6   : > { %s1632_s18 = sadd.s32 4294967294, %s1957_s16   ;;  %s2084_s19 = sadd.s32 1, %s1957_s16  }
   0x7   : > { %2579 = sst [smem:[#allocation7_spill]] %s2084_s19  ;;  %s333_s20 = sadd.s32 1, %s1953_s15 }
   0x8   : > { %s330_s21 = ssub.s32 %s1957_s16, %s2084_s19  ;;  %p343_p0 = scmp.ne.s32.totalorder %s1953_s15, %s1949_s30 }
   0x9   : > { %p331_p1 = scmp.eq.s32.totalorder %s330_s21, 0  ;;  %p344_p2 = scmp.eq.s32.totalorder %s2080_s17, 1 }
   0xa   : > { %p349_p3 = scmp.ne.s32.totalorder %s1949_s30, %s1945_s29  ;;  %p350_p4 = scmp.eq.s32.totalorder %s1632_s18, 1 }
   0xb   : > { %s2095_s22 = scalar_select %p331_p1, %s1953_s15, %s333_s20  }
   0xc   : > { %p2097_p5 = por %p344_p2, %p343_p0  ;;  %p2101_p6 = por %p350_p4, %p349_p3 }
   0xd   : > { %2580 = sst [smem:[#allocation8_spill]] %s2095_s22  ;;  %p1635_p7 = scmp.ge.s32.totalorder %s1957_s16, 1 }
   0xe   : > { %s2582_s24 = scalar_select %p2101_p6, 1, 0 }
   0xf   : > { %p415_p8 = scmp.lt.s32.totalorder %s1957_s16, 3 }
  0x10   : > { %2583 = sst [smem:[#allocation9_spill]] %s2582_s24 }
  0x11   : > { %p416_p9 = pnand %p1635_p7, %p415_p8 }
  0x12   : > { %p461_p10 = scmp.lt.s32.totalorder (!%p416_p9), %s2080_s17, 1  ;;  %s2584_s0 = sld [smem:[#allocation10_spill]] (!%p416_p9) }
  0x13   : > { %419 = sbr.rel (%p416_p9) target bundleno = 1502 (0x5de), region = 76  ;;  %s1960_s18 = smov (!%p416_p9), 5  }
  0x14   : > { %s1961_s15 = smov (!%p416_p9), 1   ;;  %s1962_s19 = smov (!%p416_p9), 3  }
  0x15   : > { %s1963_s26 = smov (!%p416_p9), 125   ;;  %s1964_s20 = smov (!%p416_p9), 127  }
  0x16   : > { %s1965_s22 = smov (!%p416_p9), 118   ;;  %s1968_s25 = smov (!%p416_p9), 123  }
  0x17   : > { %s1971_s27 = smov (!%p416_p9), 124  }
  0x18   : > { %v1872_v0 = vld [vmem:[%s2547_s1 + $0x78] sm:$0xff]   ;;  %v1874_v2 = vld [vmem:[%s2547_s1 + $0x70] sm:$0xff]   ;;  %v1959_v3 = vmov 0.0   ;;  %v1876_v5 = vld [vmem:[%s2547_s1 + $0x68] sm:$0xff]   ;;  %v651_v6 = vlaneseq  ;;  %s462_s28 = scalar_select %p461_p10, %s2080_s17, 1  ;;  %vm647_vm0 = vcmask 125952  }
  0x19   : > { %v1873_v1 = vld [vmem:[%s2547_s1 + $0x38] sm:$0xff]   ;;  %1670 = vmatprep.subr.bf16.mxu0 %v1872_v0  ;;  %469 = vst [vmem:[#allocation2 + $0x10] sm:$0xff] %v1959_v3  ;;  %467 = vst [vmem:[#allocation2] sm:$0xff] %v1959_v3  ;;  %1698 = vmatprep.subr.bf16.mxu1 %v1959_v3  ;;  %v1875_v4 = vld [vmem:[%s2547_s1 + $0x30] sm:$0xff]   ;;  %vm704_vm1 = vcmask 1031168   ;;  %vm714_vm2 = vcmask 1014784  }
  0x1a   : > { %468 = vst [vmem:[#allocation2 + $0x8] sm:$0xff] %v1959_v3  ;;  %1671 = vmatpush3.bf16.msra.mxu0 %v1873_v1  ;;  %v1877_v7 = vld [vmem:[%s2547_s1 + $0x28] sm:$0xff]   ;;  %v1878_v8 = vld [vmem:[%s2547_s1 + $0x60] sm:$0xff]   ;;  %v2134_v9 = vshrl.u32 %v651_v6, 7  ;;  %s1668_s21 = sshll.u32 %s462_s28, 3  ;;  %v1880_v11 = vld [vmem:[%s2547_s1 + $0x58] sm:$0xff]  }
  0x1b   : > { %1672 = vmatprep.subr.bf16.mxu0 %v1874_v2  ;;  %v1879_v10 = vld [vmem:[%s2547_s1 + $0x20] sm:$0xff]   ;;  %s465_s24 = scalar_lea.vmem %s2584_s0, %s1668_s21  ;;  %v1881_v13 = vld [vmem:[%s2547_s1 + $0x18] sm:$0xff]   ;;  %v1882_v14 = vld [vmem:[%s2547_s1 + $0x50] sm:$0xff]   ;;  %s1966_s28 = smov 120   ;;  %vm694_vm3 = vcmask 1039360   ;;  %vm1975_vm4 = vmmov 0  }
  0x1c   : > { %v2146_v12 = vsub.s32 2, %v2134_v9  ;;  %v2155_v15 = vsub.s32 0, %v2134_v9  ;;  %v2157_v16 = vld [vmem:[%s465_s24] sm:$0xff]  ;;  %v1883_v20 = vld [vmem:[%s2547_s1 + $0x10] sm:$0xff]   ;;  %v1884_v23 = vld [vmem:[%s2547_s1 + $0x48] sm:$0xff]   ;;  %s1969_s21 = smov 122   ;;  %1708 = vmatprep.mubr.msk.bf16.mxu1 %vm1975_vm4, %v1959_v3 }
  0x1d   : > { %v473_v17 = vld [vmem:[%s2550_s4] sm:$0x7]  ;;  %v475_v18 = vcombine.high %v2157_v16, %v2157_v16  ;;  %v1885_v24 = vld [vmem:[%s2547_s1 + $0x8] sm:$0xff]   ;;  %v477_v27 = vpack.c.bf16 %v2157_v16, %v2157_v16  ;;  %v937_v61 = vsub.s32 6, %v2134_v9  ;;  %vm776_vm5 = vcmask 1043456   ;;  %s2569_s24 = smov 95  }
  0x1e   : > { %1673 = vmatpush3.bf16.msra.mxu0 %v1875_v4  ;;  %v664_v19 = vrot.slane %v473_v17, %v2146_v12  ;;  %v654_v22 = vrot.slane %v473_v17, %v2155_v15  ;;  %v1886_v25 = vld [vmem:[%s2547_s1 + $0x40] sm:$0xff]   ;;  %v905_v17 = vsub.s32 4, %v2134_v9  ;;  %vm765_vm6 = vcmask 39936  }
  0x1f   : > { %1674 = vmatprep.subr.bf16.mxu0 %v1876_v5  ;;  %v478_v21 = vpack.c.bf16 %v475_v18, %v475_v18  ;;  %893 = vst [vmem:[#allocation2 + $0x10] sm:$0xf] %v475_v18  ;;  %v1887_v26 = vld [vmem:[%s2547_s1] sm:$0xff]   ;;  %vm1002_vm7 = vcmask 138240   ;;  %vm772_vm8 = vcmask 588800   ;;  %vm990_vm9 = vcmask 121856  }
  0x20   : > { %684 = vrot.lane.b32.xlu0 %v664_v19, %s1960_s18  ;;  %676 = vrot.lane.b32.xlu1 %v664_v19, %s1961_s15  ;;  %v472_v0 = vld [vmem:[%s2549_s3] sm:$0x77]  ;;  %vm978_vm10 = vcmask 7168   ;;  %vm955_vm11 = vcmask 924672   ;;  %vm1113_vm12 = vcmask 769024   ;;  %vm1085_vm13 = vcmask 785408  }
  0x21   : > { %639 = vmatprep.mubr.bf16.mxu0 %v478_v21  ;;  %v934_v18 = vrot.slane %v472_v0, %v2146_v12  ;;  %vm1098_vm14 = vcmask 777216   ;;  %vm1070_vm15 = vcmask 900096   ;;  %vm847_vm4 = vcmask 130048  }
  0x22   : > { %1675 = vmatpush3.bf16.msra.mxu0 %v1877_v7 }
  0x23   : > { %1676 = vmatprep.subr.bf16.mxu0 %v1878_v8 }
  0x24   : > { %680 = vrot.lane.b32.xlu0 %v654_v22, %s1962_s19  ;;  %666 = vrot.lane.b32.xlu1 %v664_v19, %s1963_s26  ;;  %s1967_s19 = smov 119   ;;  %s2567_s26 = smov 126  }
  0x26   : > { %1677 = vmatpush3.bf16.msra.mxu0 %v1879_v10  ;;  %v938_v10 = vrot.slane %v472_v0, %v937_v61 }
  0x27   : > { %1678 = vmatprep.subr.bf16.mxu0 %v1880_v11 }
  0x28   : > { %671 = vrot.lane.b32.xlu0 %v654_v22, %s1964_s20 }
  0x2a   : > { %1679 = vmatpush3.bf16.msra.mxu0 %v1881_v13 }
  0x2b   : > { %1680 = vmatprep.subr.bf16.mxu0 %v1882_v14 }
  0x2e   : > { %1681 = vmatpush3.bf16.msra.mxu0 %v1883_v20 }
  0x2f   : > { %1682 = vmatprep.subr.bf16.mxu0 %v1884_v23  ;;  %v906_v23 = vrot.slane %v472_v0, %v905_v17  ;;  %v827_v17 = vld [vmem:[%s2553_s7] sm:$0xf] }
  0x31   : > { %v2210_v9 = vrot.slane %v906_v23, %v2155_v15 }
  0x32   : > { %1683 = vmatpush3.bf16.msra.mxu0 %v1885_v24  ;;  %v944_v24 = vrot.slane %v934_v18, %v2146_v12  ;;  %v1889_v18 = vld [vmem:[%s2548_s2] ss:$8 sps:$4 sm:$0xff]  }
  0x33   : > { %1684 = vmatprep.subr.bf16.mxu0 %v1886_v25  ;;  %v902_v25 = vrot.slane %v472_v0, %v2155_v15 }
  0x36   : > { %1685 = vmatpush3.bf16.msra.mxu0 %v1887_v26  ;;  %v2214_v26 = vrot.slane %v902_v25, %v2155_v15 }
  0x39   : > { %640 = vmatmul.mubr.bf16.vlgmr.msra.gmra.mxu0 %v477_v27 }
  0x92   : > { %v685_v32 = vpop.permute.xlu0 %684  ;;  %v677_v34 = vpop.permute.xlu1 %676 }
  0x96   : > { %v681_v36 = vpop.permute.xlu0 %680  ;;  %v667_v39 = vpop.permute.xlu1 %666 }
  0x97   : > { %v669_v40 = vmul.f32 0.0, %v667_v39 }
  0x9a   : > { %v672_v42 = vpop.permute.xlu0 %671 }
  0x9b   : > { %v674_v45 = vmul.f32 0.0, %v672_v42 }
  0xf9   : > { %v1686_v28 = vpop.f32.mrf.mxu0 }
  0xfb   : > { %v1687_v29 = vpop.f32.mrf.mxu0 }
  0xfc   : > { %v1688_v30 = vadd.f32 %v1687_v29, %v1686_v28 }
  0xfd   : > { %v1689_v31 = vpop.f32.mrf.mxu0 }
  0xfe   : > { %648 = vst.msk [vmem:[#allocation2 + $0x8] sm:$0xf] %vm647_vm0, %v1688_v30  ;;  %vm923_vm0 = vcmask 908288  }
  0xff   : > { %v1690_v33 = vpop.f32.mrf.mxu0 }
 0x105   : > { %v650_v35 = vld [vmem:[#allocation2 + $0x8] sm:$0xff] }
 0x106   : > { %892 = vst [vmem:[#allocation2 + $0x8] sm:$0xf] %v2157_v16  ;;  %v687_v37 = vmul.f32 %v685_v32, %v650_v35  ;;  %v683_v38 = vmul.f32 %v681_v36, %v650_v35  ;;  %v670_v41 = vmul.f32 %v667_v39, %v650_v35  ;;  %v679_v43 = vmul.f32 %v677_v34, %v650_v35  ;;  %v2238_v39 = vld [vmem:[#allocation2 + $0x10] sm:$0xff] }
 0x107   : > { %v675_v46 = vmul.f32 %v672_v42, %v650_v35  ;;  %v1785_v48 = vpack.i.bf16 %v650_v35, %v1959_v3 }
 0x108   : > { %733 = vrot.lane.b32.xlu1 %v687_v37, %s1965_s22  ;;  %726 = vrot.lane.b32.xlu0 %v683_v38, %s1966_s28  ;;  %v1775_v44 = vpack.i.bf16 %v670_v41, %v669_v40  ;;  %s1972_s28 = smov 17   ;;  %v743_v37 = vld [vmem:[%s2551_s5] sm:$0x3]  ;;  %s2565_s22 = smov 110  }
 0x109   : > { %v1780_v47 = vpack.i.bf16 %v675_v46, %v674_v45 }
 0x10c   : > { %729 = vrot.lane.b32.xlu1 %v650_v35, %s1967_s19  ;;  %718 = vrot.lane.b32.xlu0 %v650_v35, %s1968_s25  ;;  %s1973_s19 = smov 15  }
 0x10d   : > { %v2233_v36 = vld [vmem:[#allocation2 + $0x8] sm:$0xff] }
 0x110   : > { %722 = vrot.lane.b32.xlu1 %v679_v43, %s1969_s21  ;;  %1776 = vrot.lane.b32.xlu0 %v1775_v44, %s2567_s26  ;;  %s2575_s21 = smov 94  }
 0x114   : > { %1781 = vrot.lane.b32.xlu1 %v1780_v47, %s1971_s27  ;;  %656 = vrot.lane.b32.xlu0 %v654_v22, %s1968_s25  ;;  %v948_v22 = vrot.slane %v938_v10, %v2146_v12  ;;  %v1976_v12 = vmov 0   ;;  %s2573_s27 = smov 96   ;;  %s2588_s25 = smov 126  }
 0x115   : > { %1830 = vset.pattern.permute.xlu0 %v1976_v12  ;;  %1831 = vset.pattern.permute.xlu1 %v1976_v12 }
 0x116   : > { %1528 = vmatprep.mubr.bf16.mxu0 %v1976_v12 }
 0x118   : > { %1786 = vrot.lane.b32.xlu1 %v1785_v48, %s1964_s20 }
 0x17a   : > { %v734_v49 = vpop.permute.xlu1 %733  ;;  %v727_v50 = vpop.permute.xlu0 %726 }
 0x17b   : > { %v742_v51 = vpack.c.bf16 %v734_v49, %v734_v49 }
 0x17d   : > { %763 = vrot.lane.b32.xlu0 %v742_v51, %s1960_s18 }
 0x17e   : > { %v730_v52 = vpop.permute.xlu1 %729  ;;  %v719_v53 = vpop.permute.xlu0 %718 }
 0x17f   : > { %v741_v54 = vpack.c.bf16 %v730_v52, %v727_v50 }
 0x181   : > { %761 = vrot.lane.b32.xlu1 %v741_v54, %s1960_s18 }
 0x182   : > { %v723_v55 = vpop.permute.xlu1 %722  ;;  %v1777_v56 = vpop.permute.xlu0 %1776 }
 0x183   : > { %v740_v57 = vpack.c.bf16 %v723_v55, %v719_v53  ;;  %v1779_v58 = vunpack.i.h.bf16 %v1777_v56  ;;  %v1778_v59 = vunpack.i.l.bf16 %v1777_v56 }
 0x185   : > { %759 = vrot.lane.b32.xlu0 %v740_v57, %s1960_s18  ;;  %v705_v4 = vsel %vm704_vm1, %v1778_v59, %v1779_v58 }
 0x186   : > { %v1782_v60 = vpop.permute.xlu1 %1781  ;;  %v657_v1 = vpop.permute.xlu0 %656 }
 0x187   : > { %v1784_v62 = vunpack.i.h.bf16 %v1782_v60  ;;  %v1783_v63 = vunpack.i.l.bf16 %v1782_v60  ;;  %v659_v6 = vmul.f32 0.0, %v657_v1  ;;  %v660_v11 = vmul.f32 %v657_v1, %v650_v35 }
 0x189   : > { %v739_v2 = vpack.c.bf16 %v1784_v62, %v1779_v58  ;;  %v715_v5 = vsel %vm714_vm2, %v1783_v63, %v1784_v62  ;;  %v1800_v58 = vpack.i.bf16 %v2238_v39, %v2233_v36  ;;  %vm1047_vm2 = vcmask 916480  }
 0x18a   : > { %v1787_v7 = vpop.permute.xlu1 %1786  ;;  %v738_v8 = vpack.c.bf16 %v715_v5, %v705_v4 }
 0x18b   : > { %v1789_v13 = vunpack.i.h.bf16 %v1787_v7  ;;  %v1788_v14 = vunpack.i.l.bf16 %v1787_v7  ;;  %757 = vrot.lane.b32.xlu0 %v739_v2, %s1960_s18 }
 0x18c   : > { %755 = vrot.lane.b32.xlu1 %v738_v8, %s1960_s18 }
 0x18d   : > { %v737_v19 = vpack.c.bf16 %v1789_v13, %v660_v11  ;;  %v695_v20 = vsel %vm694_vm3, %v1788_v14, %v1789_v13  ;;  %v820_v14 = vld [vmem:[%s2552_s6] sm:$0xf] }
 0x18e   : > { %v736_v21 = vpack.c.bf16 %v695_v20, %v659_v6 }
 0x18f   : > { %753 = vrot.lane.b32.xlu0 %v737_v19, %s1960_s18  ;;  %v1891_v19 = vld [vmem:[%s2548_s2 + $0x4] ss:$8 sps:$4 sm:$0xff]  }
 0x190   : > { %751 = vrot.lane.b32.xlu1 %v736_v21, %s1960_s18  ;;  %s1974_s18 = smov 113  }
 0x193   : > { %1000 = vrot.lane.b32.xlu0 %v948_v22, %s1972_s28 }
 0x194   : > { %998 = vrot.lane.b32.xlu1 %v944_v24, %s1972_s28 }
 0x197   : > { %988 = vrot.lane.b32.xlu0 %v2210_v9, %s1973_s19 }
 0x198   : > { %986 = vrot.lane.b32.xlu1 %v2214_v26, %s1973_s19  ;;  %s1981_s19 = smov 111  }
 0x19b   : > { %976 = vrot.lane.b32.xlu0 %v948_v22, %s1961_s15 }
 0x19c   : > { %974 = vrot.lane.b32.xlu1 %v944_v24, %s1961_s15  ;;  %s2587_s15 = smov 95  }
 0x19f   : > { %953 = vrot.lane.b32.xlu0 %v948_v22, %s1974_s18 }
 0x1a0   : > { %951 = vrot.lane.b32.xlu1 %v944_v24, %s1974_s18  ;;  %s2571_s18 = smov 112  }
 0x1a3   : > { %965 = vrot.lane.b32.xlu0 %v2210_v9, %s1964_s20 }
 0x1a4   : > { %963 = vrot.lane.b32.xlu1 %v2214_v26, %s1964_s20 }
 0x1ef   : > { %v764_v15 = vpop.permute.xlu0 %763 }
 0x1f0   : > { %v778_v27 = vsel %vm776_vm5, %v764_v15, 0 }
 0x1f1   : > { %1699 = vmatpush3.bf16.msra.mxu1 %v778_v27 }
 0x1f2   : > { %1700 = vmatprep.subr.bf16.mxu1 %v1959_v3 }
 0x1f3   : > { %v762_v28 = vpop.permute.xlu1 %761 }
 0x1f5   : > { %1701 = vmatpush3.bf16.msra.mxu1 %v762_v28 }
 0x1f6   : > { %1702 = vmatprep.subr.bf16.mxu1 %v1959_v3 }
 0x1f7   : > { %v760_v29 = vpop.permute.xlu0 %759 }
 0x1f9   : > { %1703 = vmatpush3.bf16.msra.mxu1 %v760_v29 }
 0x1fa   : > { %1704 = vmatprep.subr.bf16.mxu1 %v1959_v3 }
 0x1fd   : > { %v758_v30 = vpop.permute.xlu0 %757 }
 0x1fe   : > { %v756_v31 = vpop.permute.xlu1 %755 }
 0x1ff   : > { %v767_v32 = vsel %vm765_vm6, %v756_v31, %v758_v30 }
 0x200   : > { %1705 = vmatpush3.bf16.msra.mxu1 %v767_v32 }
 0x201   : > { %v754_v33 = vpop.permute.xlu0 %753  ;;  %1706 = vmatprep.subr.bf16.mxu1 %v1959_v3 }
 0x202   : > { %v752_v34 = vpop.permute.xlu1 %751 }
 0x203   : > { %v766_v35 = vsel %vm765_vm6, %v752_v34, %v754_v33 }
 0x204   : > { %1707 = vmatpush3.bf16.msra.mxu1 %v766_v35 }
 0x205   : > { %v1001_v38 = vpop.permute.xlu0 %1000  ;;  %865 = vmatprep.subr.bf16.mxu1 %v1891_v19 }
 0x206   : > { %v2240_v40 = vmul.f32 0.0, %v1001_v38  ;;  %v2242_v41 = vpop.permute.xlu1 %998 }
 0x207   : > { %v2246_v42 = vsel %vm1002_vm7, %v2242_v41, %v1001_v38  ;;  %v1007_v43 = vmul.f32 %v2242_v41, %v2233_v36  ;;  %1709 = vmatmul.mubr.msk.bf16.vlgmr.msra.gmra.mxu1 %vm772_vm8, %v743_v37 }
 0x208   : > { %v1008_v44 = vmul.f32 %v2246_v42, %v2238_v39  ;;  %1111 = vrot.lane.b32.xlu0 %v2240_v40, %s2575_s21  ;;  %883 = vmatprep.mubr.bf16.mxu1 %v1976_v12 }
 0x209   : > { %v989_v45 = vpop.permute.xlu0 %988  ;;  %866 = vmatpush1.bf16.msra.mxu1 %v1889_v18 }
 0x20a   : > { %v2256_v46 = vmul.f32 0.0, %v989_v45  ;;  %v2258_v47 = vpop.permute.xlu1 %986  ;;  %v1790_v48 = vpack.i.bf16 %v1008_v44, %v1007_v43 }
 0x20b   : > { %v2261_v49 = vsel %vm990_vm9, %v2258_v47, %v989_v45  ;;  %v995_v50 = vmul.f32 %v2258_v47, %v2233_v36 }
 0x20c   : > { %v996_v51 = vmul.f32 %v2261_v49, %v2238_v39  ;;  %1791 = vrot.lane.b32.xlu1 %v1790_v48, %s2575_s21  ;;  %1083 = vrot.lane.b32.xlu0 %v2256_v46, %s2573_s27  ;;  %s1669_s21 = sshll.u32 %s2080_s17, 7 }
 0x20d   : > { %v977_v52 = vpop.permute.xlu0 %976 }
 0x20e   : > { %v1795_v53 = vpack.i.bf16 %v996_v51, %v995_v50  ;;  %v2270_v54 = vpop.permute.xlu1 %974  ;;  %v2309_v10 = vmul.f32 0.0, %v977_v52 }
 0x20f   : > { %v2273_v55 = vsel %vm978_vm10, %v2270_v54, %v977_v52  ;;  %v983_v56 = vmul.f32 %v2270_v54, %v2233_v36 }
 0x210   : > { %1796 = vrot.lane.b32.xlu1 %v1795_v53, %s2573_s27  ;;  %v984_v57 = vmul.f32 %v2273_v55, %v2238_v39  ;;  %1096 = vrot.lane.b32.xlu0 %v1959_v3, %s2569_s24  ;;  %s2589_s27 = smov 110  }
 0x211   : > { %v2284_v59 = vpop.permute.xlu0 %953 }
 0x212   : > { %v962_v60 = vmul.f32 %v2284_v59, %v2238_v39  ;;  %v952_v61 = vpop.permute.xlu1 %951  ;;  %v1810_v62 = vpack.i.bf16 %v984_v57, %v983_v56 }
 0x213   : > { %v2289_v63 = vsel %vm955_vm11, %v952_v61, %v2284_v59  ;;  %v2301_v6 = vmul.f32 0.0, %v952_v61 }
 0x214   : > { %1801 = vrot.lane.b32.xlu1 %v1800_v58, %s2569_s24  ;;  %v961_v0 = vmul.f32 %v2289_v63, %v2233_v36  ;;  %1811 = vrot.lane.b32.xlu0 %v1810_v62, %s2565_s22 }
 0x215   : > { %v2295_v1 = vpop.permute.xlu0 %965 }
 0x216   : > { %v964_v2 = vpop.permute.xlu1 %963  ;;  %v1815_v4 = vpack.i.bf16 %v962_v60, %v961_v0  ;;  %v973_v7 = vmul.f32 %v2295_v1, %v2238_v39 }
 0x217   : > { %v2299_v5 = vsel %vm694_vm3, %v964_v2, %v2295_v1  ;;  %v2315_v13 = vmul.f32 0.0, %v964_v2 }
 0x218   : > { %1806 = vrot.lane.b32.xlu1 %v1800_v58, %s1981_s19  ;;  %v972_v8 = vmul.f32 %v2299_v5, %v2233_v36  ;;  %1816 = vrot.lane.b32.xlu0 %v1815_v4, %s2567_s26 }
 0x21a   : > { %v1820_v11 = vpack.i.bf16 %v973_v7, %v972_v8 }
 0x21c   : > { %1068 = vrot.lane.b32.xlu1 %v2309_v10, %s2565_s22  ;;  %1027 = vrot.lane.b32.xlu0 %v2301_v6, %s2567_s26  ;;  %s2585_s22 = smov 94  }
 0x220   : > { %1821 = vrot.lane.b32.xlu1 %v1820_v11, %s2571_s18  ;;  %919 = vrot.lane.b32.xlu0 %v2214_v26, %s1981_s19 }
 0x224   : > { %1041 = vrot.lane.b32.xlu1 %v2315_v13, %s2571_s18  ;;  %1826 = vrot.lane.b32.xlu0 %v1800_v58, %s1964_s20  ;;  %s2586_s18 = smov 96  }
 0x228   : > { %921 = vrot.lane.b32.xlu1 %v2210_v9, %s1981_s19  ;;  %823 = vperm.xlu0 %1830, %v820_v14  }
 0x22c   : > { %1013 = vrot.lane.b32.xlu1 %v1959_v3, %s1964_s20 }
 0x230   : > { %830 = vperm.xlu1 %1831, %v827_v17  }
 0x27a   : > { %v1112_v20 = vpop.permute.xlu0 %1111 }
 0x27e   : > { %v1792_v21 = vpop.permute.xlu1 %1791  ;;  %v1084_v22 = vpop.permute.xlu0 %1083 }
 0x27f   : > { %v1794_v23 = vunpack.i.h.bf16 %v1792_v21  ;;  %v1793_v32 = vunpack.i.l.bf16 %v1792_v21 }
 0x281   : > { %v1115_v24 = vsel %vm1113_vm12, %v1794_v23, %v1112_v20  ;;  %v1131_v38 = vpack.c.bf16 %v1793_v32, %v1793_v32  ;;  %v1114_v2 = vsel %vm1113_vm12, %v1793_v32, %v1794_v23 }
 0x282   : > { %v1797_v25 = vpop.permute.xlu1 %1796  ;;  %v1133_v9 = vpack.c.bf16 %v1115_v24, %v1115_v24  ;;  %v1097_v26 = vpop.permute.xlu0 %1096  ;;  %v1132_v19 = vpack.c.bf16 %v1114_v2, %v1114_v2 }
 0x283   : > { %v1799_v15 = vunpack.i.h.bf16 %v1797_v25  ;;  %v1798_v56 = vunpack.i.l.bf16 %v1797_v25 }
 0x284   : > { %1178 = vrot.lane.b32.xlu1 %v1133_v9, %s1972_s28 }
 0x285   : > { %v1087_v30 = vsel %vm1085_vm13, %v1799_v15, %v1084_v22  ;;  %v1086_v9 = vsel %vm1085_vm13, %v1798_v56, %v1799_v15 }
 0x286   : > { %v1802_v27 = vpop.permute.xlu1 %1801  ;;  %v1812_v28 = vpop.permute.xlu0 %1811 }
 0x287   : > { %v1804_v29 = vunpack.i.h.bf16 %v1802_v27  ;;  %v1814_v37 = vunpack.i.h.bf16 %v1812_v28  ;;  %v1813_v43 = vunpack.i.l.bf16 %v1812_v28  ;;  %v1803_v52 = vunpack.i.l.bf16 %v1802_v27 }
 0x289   : > { %v1100_v31 = vsel %vm1098_vm14, %v1804_v29, %v1097_v26  ;;  %v1071_v62 = vsel %vm1070_vm15, %v1813_v43, %v1814_v37  ;;  %v1128_v0 = vpack.c.bf16 %v1803_v52, %v1798_v56  ;;  %v1099_v21 = vsel %vm1098_vm14, %v1803_v52, %v1804_v29 }
 0x28a   : > { %v1807_v33 = vpop.permute.xlu1 %1806  ;;  %v1130_v34 = vpack.c.bf16 %v1100_v31, %v1087_v30  ;;  %v1817_v35 = vpop.permute.xlu0 %1816  ;;  %v1129_v28 = vpack.c.bf16 %v1099_v21, %v1086_v9 }
 0x28b   : > { %v1809_v44 = vunpack.i.h.bf16 %v1807_v33  ;;  %v1808_v45 = vunpack.i.l.bf16 %v1807_v33  ;;  %v1819_v4 = vunpack.i.h.bf16 %v1817_v35  ;;  %v1818_v23 = vunpack.i.l.bf16 %v1817_v35 }
 0x28c   : > { %1172 = vrot.lane.b32.xlu1 %v1130_v34, %s1972_s28 }
 0x28d   : > { %v1125_v57 = vpack.c.bf16 %v1813_v43, %v1808_v45  ;;  %v1057_v61 = vsel %vm923_vm0, %v1808_v45, %v1809_v44  ;;  %v1034_v29 = vsel %vm704_vm1, %v1818_v23, %v1819_v4 }
 0x28e   : > { %v1069_v48 = vpop.permute.xlu1 %1068  ;;  %v1028_v50 = vpop.permute.xlu0 %1027  ;;  %v1126_v11 = vpack.c.bf16 %v1071_v62, %v1057_v61 }
 0x28f   : > { %v1072_v51 = vsel %vm1070_vm15, %v1814_v37, %v1069_v48  ;;  %v1033_v37 = vsel %vm704_vm1, %v1028_v50, %v1818_v23  ;;  %v1249_v48 = vld [vmem:[%s2555_s9] sm:$0xf] }
 0x290   : > { %v1127_v53 = vpack.c.bf16 %v1072_v51, %v1809_v44  ;;  %1174 = vrot.lane.b32.xlu1 %v1131_v38, %s1972_s28  ;;  %v1257_v44 = vld [vmem:[%s2556_s10] sm:$0xf] }
 0x292   : > { %v1822_v58 = vpop.permute.xlu1 %1821  ;;  %1166 = vrot.lane.b32.xlu0 %v1127_v53, %s1972_s28  ;;  %v2347_v60 = vpop.permute.xlu0 %919 }
 0x293   : > { %v1824_v7 = vunpack.i.h.bf16 %v1822_v58  ;;  %v1823_v20 = vunpack.i.l.bf16 %v1822_v58  ;;  %v928_v31 = vmul.f32 0.0, %v2347_v60 }
 0x294   : > { %1162 = vrot.lane.b32.xlu1 %v1125_v57, %s1972_s28 }
 0x295   : > { %v1124_v22 = vpack.c.bf16 %v1824_v7, %v1819_v4  ;;  %v1049_v30 = vsel %vm1047_vm2, %v1823_v20, %v1824_v7 }
 0x296   : > { %v1042_v8 = vpop.permute.xlu1 %1041  ;;  %1168 = vrot.lane.b32.xlu0 %v1128_v0, %s1972_s28  ;;  %v1827_v14 = vpop.permute.xlu0 %1826  ;;  %v1123_v34 = vpack.c.bf16 %v1049_v30, %v1034_v29 }
 0x297   : > { %v1829_v17 = vunpack.i.h.bf16 %v1827_v14  ;;  %v1828_v18 = vunpack.i.l.bf16 %v1827_v14 }
 0x298   : > { %1164 = vrot.lane.b32.xlu1 %v1126_v11, %s1972_s28 }
 0x299   : > { %v1020_v26 = vsel %vm694_vm3, %v1828_v18, %v1829_v17 }
 0x29a   : > { %v2356_v24 = vpop.permute.xlu1 %921  ;;  %1176 = vrot.lane.b32.xlu0 %v1132_v19, %s1972_s28 }
 0x29b   : > { %v2362_v25 = vsel %vm923_vm0, %v2347_v60, %v2356_v24  ;;  %v930_v43 = vmul.f32 %v2356_v24, %v2238_v39 }
 0x29c   : > { %v929_v27 = vmul.f32 %v2362_v25, %v2233_v36  ;;  %1160 = vrot.lane.b32.xlu1 %v1124_v22, %s1972_s28  ;;  %v1048_v36 = vsel %vm1047_vm2, %v1042_v8, %v1823_v20 }
 0x29d   : > { %v1122_v38 = vpack.c.bf16 %v1048_v36, %v1033_v37  ;;  %v1121_v45 = vpack.c.bf16 %v1829_v17, %v930_v43 }
 0x29e   : > { %v1014_v32 = vpop.permute.xlu1 %1013  ;;  %1170 = vrot.lane.b32.xlu0 %v1129_v28, %s1972_s28  ;;  %v1120_v33 = vpack.c.bf16 %v1020_v26, %v929_v27 }
 0x29f   : > { %v1019_v15 = vsel %vm694_vm3, %v1014_v32, %v1828_v18  ;;  %v1134_v32 = vld [vmem:[%s2554_s8] sm:$0x3] }
 0x2a0   : > { %1152 = vrot.lane.b32.xlu1 %v1120_v33, %s1972_s28  ;;  %v1119_v35 = vpack.c.bf16 %v1019_v15, %v928_v31 }
 0x2a2   : > { %1158 = vrot.lane.b32.xlu0 %v1123_v34, %s1972_s28 }
 0x2a3   : > { %v824_v39 = vpop.permute.xlu0 %823 }
 0x2a4   : > { %1150 = vrot.lane.b32.xlu1 %v1119_v35, %s1972_s28 }
 0x2a6   : > { %1156 = vrot.lane.b32.xlu0 %v1122_v38, %s1972_s28 }
 0x2a8   : > { %1260 = vperm.xlu1 %1831, %v1257_v44  }
 0x2aa   : > { %1154 = vrot.lane.b32.xlu0 %v1121_v45, %s1972_s28 }
 0x2ab   : > { %v831_v51 = vpop.permute.xlu1 %830 }
 0x2ac   : > { %1401 = vrot.lane.b32.xlu1 %v2240_v40, %s2585_s22 }
 0x2ae   : > { %1252 = vperm.xlu0 %1830, %v1249_v48  }
 0x2b0   : > { %1375 = vrot.lane.b32.xlu1 %v2256_v46, %s2586_s18 }
 0x2b4   : > { %1387 = vrot.lane.b32.xlu1 %v1959_v3, %s2587_s15 }
 0x2b8   : > { %1321 = vrot.lane.b32.xlu1 %v2301_v6, %s2588_s25 }
 0x2c7   : > { %v814_v50 = vpop.f32.mrf.mxu1 }
 0x2c8   : > { %v826_v52 = vmul.f32 %v824_v39, %v814_v50 }
 0x2c9   : > { %v1710_v53 = vpop.f32.mrf.mxu1 }
 0x2ca   : > { %v833_v56 = vadd.f32 %v831_v51, %v826_v52 }
 0x2cb   : > { %v817_v57 = vpop.f32.mrf.mxu1 }
 0x2cc   : > { %v834_v58 = vpack.c.bf16 %v833_v56, %v833_v56 }
 0x2cd   : > { %v1711_v40 = vpop.f32.mrf.mxu1 }
 0x2ce   : > { %1658 = vmatmul.mubr.msk.bf16.vlgmr.msra.gmra.mxu1 %vm847_vm4, %v834_v58 }
 0x2cf   : > { %1240 = vmatprep.mubr.bf16.mxu1 %v1976_v12 }
 0x2f6   : > { %v1179_v46 = vpop.permute.xlu1 %1178 }
 0x2fe   : > { %v1173_v61 = vpop.permute.xlu1 %1172 }
 0x302   : > { %v1175_v62 = vpop.permute.xlu1 %1174 }
 0x304   : > { %v1167_v0 = vpop.permute.xlu0 %1166 }
 0x306   : > { %v1163_v2 = vpop.permute.xlu1 %1162 }
 0x308   : > { %v1169_v4 = vpop.permute.xlu0 %1168 }
 0x30a   : > { %v1165_v6 = vpop.permute.xlu1 %1164 }
 0x30b   : > { %v1186_v20 = vsel %vm1002_vm7, %v1165_v6, %v1167_v0  ;;  %v1185_v23 = vsel %vm1002_vm7, %v1163_v2, %v1165_v6 }
 0x30c   : > { %v1177_v7 = vpop.permute.xlu0 %1176 }
 0x30d   : > { %v1189_v8 = vsel %vm1002_vm7, %v1175_v62, %v1177_v7  ;;  %v1190_v11 = vsel %vm1002_vm7, %v1177_v7, %v1179_v46 }
 0x30e   : > { %v1203_v14 = vsel %vm776_vm5, %v1189_v8, 0  ;;  %1659 = vmatprep.subr.msk.bf16.mxu1 %vm776_vm5, %v1190_v11  ;;  %v1161_v17 = vpop.permute.xlu1 %1160 }
 0x30f   : > { %1215 = vmatpush1.bf16.msra.mxu1 %v1203_v14 }
 0x310   : > { %v1171_v18 = vpop.permute.xlu0 %1170 }
 0x311   : > { %v1187_v12 = vsel %vm1002_vm7, %v1169_v4, %v1171_v18  ;;  %v1188_v19 = vsel %vm1002_vm7, %v1171_v18, %v1173_v61 }
 0x312   : > { %1216 = vmatprep.subr.bf16.mxu1 %v1188_v19  ;;  %v1153_v22 = vpop.permute.xlu1 %1152 }
 0x313   : > { %1217 = vmatpush1.bf16.msra.mxu1 %v1187_v12 }
 0x314   : > { %1218 = vmatprep.subr.bf16.mxu1 %v1186_v20  ;;  %v1159_v21 = vpop.permute.xlu0 %1158 }
 0x315   : > { %v1184_v9 = vsel %vm1002_vm7, %v1159_v21, %v1161_v17 }
 0x316   : > { %v1151_v28 = vpop.permute.xlu1 %1150 }
 0x317   : > { %1219 = vmatpush1.bf16.msra.mxu1 %v1185_v23  ;;  %v1181_v31 = vsel %vm1002_vm7, %v1151_v28, %v1153_v22 }
 0x318   : > { %1220 = vmatprep.subr.bf16.mxu1 %v1184_v9  ;;  %v1157_v26 = vpop.permute.xlu0 %1156 }
 0x319   : > { %v1183_v27 = vsel %vm1002_vm7, %v1157_v26, %v1159_v21 }
 0x31b   : > { %1221 = vmatpush1.bf16.msra.mxu1 %v1183_v27 }
 0x31c   : > { %v1155_v29 = vpop.permute.xlu0 %1154 }
 0x31d   : > { %v1182_v30 = vsel %vm1002_vm7, %v1153_v22, %v1155_v29 }
 0x31e   : > { %1222 = vmatprep.subr.bf16.mxu1 %v1182_v30 }
 0x31f   : > { %1223 = vmatpush1.bf16.msra.mxu1 %v1181_v31 }
 0x322   : > { %1660 = vmatmul.mubr.msk.bf16.vlgmr.msra.gmra.mxu1 %vm772_vm8, %v1134_v32 }
 0x323   : > { %v1261_v52 = vpop.permute.xlu1 %1260 }
 0x329   : > { %v1253_v48 = vpop.permute.xlu0 %1252 }
 0x38e   : > { %v885_v33 = vpop.f32.mrf.mxu1 }
 0x390   : > { %v887_v15 = vpop.f32.mrf.mxu1 }
 0x391   : > { %v1267_v35 = vcombine.low %v885_v33, %v887_v15 }
 0x392   : > { %v889_v34 = vpop.f32.mrf.mxu1 }
 0x393   : > { %v1269_v37 = vadd.f32 %v1267_v35, %v2157_v16 }
 0x394   : > { %v890_v36 = vpop.f32.mrf.mxu1 }
 0x395   : > { %v1270_v38 = vsub.f32 0.0, %v1269_v37 }
 0x397   : > { %v1271_v43 = vmul.f32 1.442695, %v1270_v38 }
 0x399   : > { %1892 = vpow2.f32 %v1271_v43 }
 0x3a6   : > { %v1893_v44 = vpop.eup %1892 }
 0x3a7   : > { %v1273_v45 = vadd.f32 1.0, %v1893_v44 }
 0x3a9   : > { %1894 = vrcp.f32 %v1273_v45 }
 0x3b6   : > { %v1895_v51 = vpop.eup %1894 }
 0x3b7   : > { %v1276_v61 = vcombine.high %v1895_v51, %v1895_v51 }
 0x3e2   : > { %v1242_v39 = vpop.f32.mrf.mxu1 }
 0x3e3   : > { %v1255_v50 = vmul.f32 %v1253_v48, %v1242_v39 }
 0x3e4   : > { %v1244_v53 = vpop.f32.mrf.mxu1 }
 0x3e5   : > { %v1263_v56 = vadd.f32 %v1261_v52, %v1255_v50  ;;  %v1256_v57 = vmul.f32 %v1253_v48, %v1244_v53 }
 0x3e6   : > { %v1246_v58 = vpop.f32.mrf.mxu1 }
 0x3e7   : > { %v1278_v40 = vmul.f32 %v1895_v51, %v1263_v56  ;;  %v1264_v46 = vadd.f32 %v1261_v52, %v1256_v57 }
 0x3e8   : > { %v1247_v62 = vpop.f32.mrf.mxu1 }
 0x3e9   : > { %1280 = vst [vmem:[#allocation2 + $0x8] sm:$0xf] %v1278_v40  ;;  %v1279_v16 = vmul.f32 %v1276_v61, %v1264_v46 }
 0x3eb   : > { %1281 = vst [vmem:[#allocation2 + $0x10] sm:$0xf] %v1279_v16 }
 0x3f0   : > { %v2415_v0 = vld [vmem:[#allocation2 + $0x8] sm:$0xff] }
 0x3f1   : > { %v1295_v6 = vmul.f32 %v2415_v0, %v2270_v54  ;;  %v1290_v14 = vmul.f32 %v2415_v0, %v2289_v63  ;;  %v1298_v63 = vmul.f32 %v2415_v0, %v2258_v47  ;;  %v1402_v47 = vpop.permute.xlu1 %1401 }
 0x3f2   : > { %v2417_v2 = vld [vmem:[#allocation2 + $0x10] sm:$0xff] }
 0x3f3   : > { %v1832_v4 = vpack.i.bf16 %v2417_v2, %v2415_v0  ;;  %v1296_v7 = vmul.f32 %v2417_v2, %v2273_v55  ;;  %v1291_v11 = vmul.f32 %v2417_v2, %v2284_v59  ;;  %v1302_v17 = vmul.f32 %v2417_v2, %v2246_v42 }
 0x3f4   : > { %v1301_v55 = vmul.f32 %v2415_v0, %v2242_v41  ;;  %v1299_v59 = vmul.f32 %v2417_v2, %v2261_v49  ;;  %v1294_v12 = vmul.f32 %v2417_v2, %v2295_v1  ;;  %v1293_v41 = vmul.f32 %v2415_v0, %v2299_v5 }
 0x3f5   : > { %1833 = vrot.lane.b32.xlu0 %v1832_v4, %s2587_s15  ;;  %v1852_v8 = vpack.i.bf16 %v1296_v7, %v1295_v6  ;;  %v1857_v54 = vpack.i.bf16 %v1291_v11, %v1290_v14  ;;  %v1376_v19 = vpop.permute.xlu1 %1375  ;;  %s1983_s15 = smov [#allocation3]  }
 0x3f6   : > { %v1842_v18 = vpack.i.bf16 %v1302_v17, %v1301_v55  ;;  %v1847_v42 = vpack.i.bf16 %v1299_v59, %v1298_v63  ;;  %v1862_v49 = vpack.i.bf16 %v1294_v12, %v1293_v41  ;;  %s1901_s17 = sshll.u32 %s1983_s15, 4  ;;  %s1902_s17 = int_to_ptr.vmem [resolvable:$false] %s1901_s17 }
 0x3f7   : > { %1853 = vrot.lane.b32.xlu1 %v1852_v8, %s2589_s27 }
 0x3f9   : > { %1838 = vrot.lane.b32.xlu0 %v1832_v4, %s1981_s19  ;;  %s2590_s19 = smov 112   ;;  %v1388_v20 = vpop.permute.xlu1 %1387 }
 0x3fb   : > { %1858 = vrot.lane.b32.xlu1 %v1857_v54, %s2588_s25  ;;  %s458_s25 = sand.u32 1, %s1949_s30  }
 0x3fc   : > { %s1636_s26 = sshll.u32 %s458_s25, 3 }
 0x3fd   : > { %1843 = vrot.lane.b32.xlu0 %v1842_v18, %s2585_s22  ;;  %v1322_v22 = vpop.permute.xlu1 %1321  ;;  %s1571_s22 = scalar_lea.hbm %s2560_s14, %s1669_s21 }
 0x3ff   : > { %1868 = vrot.lane.b32.xlu1 %v1832_v4, %s1964_s20 }
 0x401   : > { %1848 = vrot.lane.b32.xlu0 %v1847_v42, %s2586_s18  ;;  %v1287_v42 = vmul.f32 %v2415_v0, %v2362_v25  ;;  %v1537_v25 = vld [vmem:[%s2558_s12] sm:$0xf]  ;;  %s1559_s18 = scalar_lea.sflag [#allocation4], %s458_s25 }
 0x405   : > { %1361 = vrot.lane.b32.xlu0 %v2309_v10, %s2589_s27  ;;  %s460_s27 = scalar_lea.vmem [#allocation3], %s1636_s26  ;;  %s1903_s26 = scalar_lea.vmem %s1902_s17, 256 }
 0x409   : > { %1863 = vrot.lane.b32.xlu0 %v1862_v49, %s2590_s19 }
 0x40d   : > { %1335 = vrot.lane.b32.xlu0 %v2315_v13, %s2590_s19  ;;  %s1573_s19 = sshll.u32 %s460_s27, 4  ;;  %s1574_s19 = int_to_ptr.vmem [resolvable:$true] %s1573_s19 }
 0x40e   : > { %p1904_p0 = scmp.lt.s32.totalorder %s1574_s19, %s1902_s17 }
 0x411   : > { %1307 = vrot.lane.b32.xlu0 %v1959_v3, %s1964_s20 }
 0x467   : > { %v1834_v21 = vpop.permute.xlu0 %1833 }
 0x468   : > { %v1835_v29 = vunpack.i.l.bf16 %v1834_v21  ;;  %v1836_v36 = vunpack.i.h.bf16 %v1834_v21  ;;  %v1288_v21 = vmul.f32 %v2417_v2, %v2356_v24 }
 0x469   : > { %v1854_v9 = vpop.permute.xlu1 %1853 }
 0x46a   : > { %v1855_v30 = vunpack.i.l.bf16 %v1854_v9  ;;  %v1856_v50 = vunpack.i.h.bf16 %v1854_v9  ;;  %v1389_v51 = vsel %vm1098_vm14, %v1835_v29, %v1836_v36  ;;  %v1390_v52 = vsel %vm1098_vm14, %v1836_v36, %v1388_v20 }
 0x46b   : > { %v1839_v1 = vpop.permute.xlu0 %1838 }
 0x46c   : > { %v1840_v26 = vunpack.i.l.bf16 %v1839_v1  ;;  %v1841_v43 = vunpack.i.h.bf16 %v1839_v1  ;;  %v1363_v4 = vsel %vm1070_vm15, %v1855_v30, %v1856_v50 }
 0x46d   : > { %v1859_v35 = vpop.permute.xlu1 %1858 }
 0x46e   : > { %v1414_v13 = vpack.c.bf16 %v1855_v30, %v1840_v26  ;;  %v1860_v39 = vunpack.i.l.bf16 %v1859_v35  ;;  %v1350_v40 = vsel %vm923_vm0, %v1840_v26, %v1841_v43  ;;  %v1861_v17 = vunpack.i.h.bf16 %v1859_v35 }
 0x46f   : > { %v1844_v23 = vpop.permute.xlu0 %1843  ;;  %v1415_v7 = vpack.c.bf16 %v1363_v4, %v1350_v40 }
 0x470   : > { %v1845_v10 = vunpack.i.l.bf16 %v1844_v23  ;;  %v1846_v27 = vunpack.i.h.bf16 %v1844_v23  ;;  %v1327_v61 = vsel %vm704_vm1, %v1322_v22, %v1860_v39  ;;  %v1328_v12 = vsel %vm704_vm1, %v1860_v39, %v1861_v17 }
 0x471   : > { %v1869_v46 = vpop.permute.xlu1 %1868 }
 0x472   : > { %v1420_v5 = vpack.c.bf16 %v1845_v10, %v1845_v10  ;;  %v1403_v15 = vsel %vm1113_vm12, %v1845_v10, %v1846_v27  ;;  %v1404_v34 = vsel %vm1113_vm12, %v1846_v27, %v1402_v47  ;;  %v1871_v8 = vunpack.i.h.bf16 %v1869_v46 }
 0x473   : > { %v1849_v28 = vpop.permute.xlu0 %1848  ;;  %v1421_v37 = vpack.c.bf16 %v1403_v15, %v1403_v15  ;;  %v1422_v38 = vpack.c.bf16 %v1404_v34, %v1404_v34  ;;  %v1870_v11 = vunpack.i.l.bf16 %v1869_v46 }
 0x474   : > { %v1850_v31 = vunpack.i.l.bf16 %v1849_v28  ;;  %1463 = vrot.lane.b32.xlu1 %v1420_v5, %s1972_s28  ;;  %v1851_v32 = vunpack.i.h.bf16 %v1849_v28  ;;  %v1410_v1 = vpack.c.bf16 %v1871_v8, %v1288_v21 }
 0x475   : > { %v1314_v59 = vsel %vm694_vm3, %v1870_v11, %v1871_v8 }
 0x476   : > { %v1417_v3 = vpack.c.bf16 %v1835_v29, %v1850_v31  ;;  %v1377_v45 = vsel %vm1085_vm13, %v1850_v31, %v1851_v32  ;;  %v1378_v48 = vsel %vm1085_vm13, %v1851_v32, %v1376_v19  ;;  %v1409_v49 = vpack.c.bf16 %v1314_v59, %v1287_v42  ;;  %v1896_v19 = vld [vmem:[#allocation2] sm:$0xff] }
 0x477   : > { %v1362_v33 = vpop.permute.xlu0 %1361  ;;  %v1418_v56 = vpack.c.bf16 %v1389_v51, %v1377_v45  ;;  %v1419_v57 = vpack.c.bf16 %v1390_v52, %v1378_v48  ;;  %v1286_v20 = vmul.f32 %v1896_v19, %v2347_v60  ;;  %v1545_v60 = vld [vmem:[%s2559_s13] sm:$0xf] }
 0x478   : > { %1457 = vrot.lane.b32.xlu0 %v1417_v3, %s1972_s28  ;;  %1451 = vrot.lane.b32.xlu1 %v1414_v13, %s1972_s28  ;;  %v1364_v14 = vsel %vm1070_vm15, %v1856_v50, %v1362_v33  ;;  %v1423_v48 = vld [vmem:[%s2557_s11] sm:$0x3] }
 0x479   : > { %v1416_v54 = vpack.c.bf16 %v1364_v14, %v1841_v43 }
 0x47b   : > { %v1864_v44 = vpop.permute.xlu0 %1863 }
 0x47c   : > { %1465 = vrot.lane.b32.xlu0 %v1421_v37, %s1972_s28  ;;  %1467 = vrot.lane.b32.xlu1 %v1422_v38, %s1972_s28  ;;  %v1865_v53 = vunpack.i.l.bf16 %v1864_v44  ;;  %v1866_v6 = vunpack.i.h.bf16 %v1864_v44 }
 0x47e   : > { %v1413_v55 = vpack.c.bf16 %v1866_v6, %v1861_v17  ;;  %v1342_v18 = vsel %vm1047_vm2, %v1865_v53, %v1866_v6 }
 0x47f   : > { %v1336_v58 = vpop.permute.xlu0 %1335  ;;  %v1412_v41 = vpack.c.bf16 %v1342_v18, %v1328_v12 }
 0x480   : > { %v1341_v62 = vsel %vm1047_vm2, %v1336_v58, %v1865_v53  ;;  %1459 = vrot.lane.b32.xlu0 %v1418_v56, %s1972_s28  ;;  %1461 = vrot.lane.b32.xlu1 %v1419_v57, %s1972_s28 }
 0x481   : > { %v1411_v16 = vpack.c.bf16 %v1341_v62, %v1327_v61 }
 0x483   : > { %v1308_v63 = vpop.permute.xlu0 %1307 }
 0x484   : > { %1453 = vrot.lane.b32.xlu1 %v1415_v7, %s1972_s28  ;;  %1445 = vrot.lane.b32.xlu0 %v1411_v16, %s1972_s28  ;;  %v1313_v47 = vsel %vm694_vm3, %v1308_v63, %v1870_v11 }
 0x485   : > { %v1408_v22 = vpack.c.bf16 %v1313_v47, %v1286_v20 }
 0x488   : > { %1449 = vrot.lane.b32.xlu1 %v1413_v55, %s1972_s28  ;;  %1455 = vrot.lane.b32.xlu0 %v1416_v54, %s1972_s28 }
 0x48c   : > { %1447 = vrot.lane.b32.xlu0 %v1412_v41, %s1972_s28  ;;  %1441 = vrot.lane.b32.xlu1 %v1409_v49, %s1972_s28 }
 0x490   : > { %1443 = vrot.lane.b32.xlu0 %v1410_v1, %s1972_s28  ;;  %1439 = vrot.lane.b32.xlu1 %v1408_v22, %s1972_s28  ;;  %s1897_s28 = scalar_lea.vmem %s1574_s19, 128 }
 0x491   : > { %p1898_p11 = scmp.ne.s32.totalorder %s1574_s19, %s1897_s28  ;;  %p1905_p1 = scmp.lt.s32.totalorder %s1903_s26, %s1897_s28 }
 0x493   : > { %p1899_p12 = pnand %p1898_p11, %p2097_p5  ;;  %p1906_p2 = por %p1905_p1, %p1904_p0 }
 0x494   : > { %1540 = vperm.xlu0 %1830, %v1537_v25   ;;  %1548 = vperm.xlu1 %1831, %v1545_v60  }
 0x495   : > { %p1900_p13 = pneg %p1899_p12 }
 0x497   : > { %p1907_p3 = pnand %p1906_p2, %p1900_p13 }
 0x4e6   : > { %v1464_v24 = vpop.permute.xlu1 %1463 }
 0x4ea   : > { %v1458_v0 = vpop.permute.xlu0 %1457  ;;  %v1452_v2 = vpop.permute.xlu1 %1451 }
 0x4ee   : > { %v1466_v23 = vpop.permute.xlu0 %1465  ;;  %v1468_v10 = vpop.permute.xlu1 %1467 }
 0x4ef   : > { %v1477_v9 = vsel %vm1002_vm7, %v1464_v24, %v1466_v23  ;;  %v1478_v26 = vsel %vm1002_vm7, %v1466_v23, %v1468_v10 }
 0x4f0   : > { %v1491_v5 = vsel %vm776_vm5, %v1477_v9, 0  ;;  %1661 = vmatprep.subr.msk.bf16.mxu0 %vm776_vm5, %v1478_v26 }
 0x4f1   : > { %1503 = vmatpush1.bf16.msra.mxu0 %v1491_v5 }
 0x4f2   : > { %v1460_v27 = vpop.permute.xlu0 %1459  ;;  %v1462_v28 = vpop.permute.xlu1 %1461 }
 0x4f3   : > { %v1475_v29 = vsel %vm1002_vm7, %v1458_v0, %v1460_v27  ;;  %v1476_v30 = vsel %vm1002_vm7, %v1460_v27, %v1462_v28 }
 0x4f4   : > { %1504 = vmatprep.subr.bf16.mxu0 %v1476_v30 }
 0x4f5   : > { %1505 = vmatpush1.bf16.msra.mxu0 %v1475_v29 }
 0x4f6   : > { %v1454_v31 = vpop.permute.xlu1 %1453  ;;  %v1446_v13 = vpop.permute.xlu0 %1445 }
 0x4f7   : > { %v1473_v15 = vsel %vm1002_vm7, %v1452_v2, %v1454_v31 }
 0x4fa   : > { %v1450_v3 = vpop.permute.xlu1 %1449  ;;  %v1456_v32 = vpop.permute.xlu0 %1455 }
 0x4fb   : > { %v1474_v33 = vsel %vm1002_vm7, %v1454_v31, %v1456_v32 }
 0x4fc   : > { %1506 = vmatprep.subr.bf16.mxu0 %v1474_v33 }
 0x4fd   : > { %1507 = vmatpush1.bf16.msra.mxu0 %v1473_v15 }
 0x4fe   : > { %v1448_v34 = vpop.permute.xlu0 %1447  ;;  %v1442_v36 = vpop.permute.xlu1 %1441 }
 0x4ff   : > { %v1471_v35 = vsel %vm1002_vm7, %v1446_v13, %v1448_v34  ;;  %v1472_v37 = vsel %vm1002_vm7, %v1448_v34, %v1450_v3 }
 0x500   : > { %1508 = vmatprep.subr.bf16.mxu0 %v1472_v37 }
 0x501   : > { %1509 = vmatpush1.bf16.msra.mxu0 %v1471_v35 }
 0x502   : > { %v1444_v38 = vpop.permute.xlu0 %1443  ;;  %v1440_v43 = vpop.permute.xlu1 %1439 }
 0x503   : > { %v1469_v44 = vsel %vm1002_vm7, %v1440_v43, %v1442_v36  ;;  %v1470_v45 = vsel %vm1002_vm7, %v1442_v36, %v1444_v38 }
 0x504   : > { %1510 = vmatprep.subr.bf16.mxu0 %v1470_v45 }
 0x505   : > { %1511 = vmatpush1.bf16.msra.mxu0 %v1469_v44 }
 0x508   : > { %1662 = vmatmul.mubr.msk.bf16.vlgmr.msra.gmra.mxu0 %vm772_vm8, %v1423_v48 }
 0x50f   : > { %v1541_v39 = vpop.permute.xlu0 %1540  ;;  %v1549_v56 = vpop.permute.xlu1 %1548 }
 0x5c8   : > { %v1530_v50 = vpop.f32.mrf.mxu0 }
 0x5c9   : > { %v1543_v51 = vmul.f32 %v1541_v39, %v1530_v50 }
 0x5ca   : > { %v1532_v52 = vpop.f32.mrf.mxu0 }
 0x5cb   : > { %v1544_v53 = vmul.f32 %v1541_v39, %v1532_v52  ;;  %v1551_v58 = vadd.f32 %v1549_v56, %v1543_v51 }
 0x5cc   : > { %v1534_v57 = vpop.f32.mrf.mxu0 }
 0x5cd   : > { %v1552_v40 = vadd.f32 %v1549_v56, %v1544_v53 }
 0x5ce   : > { %v1535_v46 = vpop.f32.mrf.mxu0 }
 0x5cf   : > { %v1555_v61 = vcombine.low %v1551_v58, %v1552_v40 }
 0x5d1   : > { %1557 = vst [vmem:[%s460_s27] sm:$0xff] %v1555_v61 }
 0x5d2   : > { %1910 = shalt.err (!%p1907_p3)
}
 0x5d3   : > { %s1911_s0 = scalar_lea.hbm %s1571_s22, 128  ;;  %s1915_s27 = scalar_lea.hbm %s2560_s14, 256 }
 0x5d4   : > { %p1912_p4 = scmp.ne.s32.totalorder %s1571_s22, %s1911_s0  ;;  %p1916_p9 = scmp.lt.s32.totalorder %s1571_s22, %s2560_s14 }
 0x5d5   : > { %p1917_p10 = scmp.lt.s32.totalorder %s1915_s27, %s1911_s0 }
 0x5d6   : > { %p1913_p7 = pnand %p1912_p4, %p2097_p5 }
 0x5d7   : > { %p1918_p11 = por %p1917_p10, %p1916_p9 }
 0x5d8   : > { %p1914_p8 = pneg %p1913_p7 }
 0x5da   : > { %p1919_p12 = pnand %p1918_p11, %p1914_p8 }
 0x5dc   : > { %1922 = shalt.err (!%p1919_p12)
}
 0x5dd   : > { %1712 = dma.vmem_to_hbm [thread:$0]  (%p2097_p5), %s1574_s19, 128, %s1571_s22, %s1559_s18  }
 0x5de PF: > { %p1718_p13 = scmp.ge.s32.totalorder %s1957_s16, 2  ;;  %s1585_s15 = sand.u32 1, %s1945_s29  }
 0x5df   : > { %s1586_s17 = scalar_lea.sflag [#allocation4], %s1585_s15 }
 0x5e0   : > { %p1715_p0 = pnand %p1718_p13, %p2101_p6 }
 0x5e2   : > { %p1716_p1 = pneg %p1715_p0 }
 0x5e4   : > { %1940 = dma.done.wait (%p1716_p1), %s1586_s17, 128  }
 0x5e5   : > { %1942 = vsyncadd (%p1716_p1), %s1586_s17, 4294967168  ;;  %s2592_s16 = sld [smem:[#allocation7_spill]]  ;;  %s2595_s29 = smov %s1949_s30 }
 0x5e6   : > { %s2593_s0 = sld [smem:[#allocation6_spill]] }
 0x5e7   : > { %s2594_s15 = sld [smem:[#allocation8_spill]] }
 0x5eb   : > { %p24_p2 = scmp.ge.s32.totalorder %s2592_s16, 4  }
 0x5ec   : > { %s2596_s30 = smov %s2593_s0 }
 0x5ed   :  { %26 = sbr.rel (!%p24_p2) target bundleno = 5 (0x5), region = 111 }
 0x5f2   :  { %1591 = vsyncpa [#allocation4], 1 }
 0x5f3   :  { %1593 = vsyncpa [#allocation4 + $0x1], 1 }

</bundles_post_ra>
